<compile_context>
chip_gen: v7x
topology: tpu7x:2x2x1
jax: 0.10.0
libtpu: 0.0.40
codegen_flags: <defaults>
</compile_context>

<pallas_src>
import functools

import jax
import jax.numpy as jnp
from jax import lax
from jax.experimental import pallas as pl
from jax.experimental.pallas import tpu as pltpu


def _activation(name):
    if name == "relu":
        return lambda x: jnp.maximum(x, 0.0)
    if name == "sigmoid":
        return jax.nn.sigmoid
    if name == "tanh":
        return jnp.tanh
    raise ValueError(f"unknown activation {name}")


def _round_up(x, m):
    return (x + m - 1) // m * m


def _cdiv(a, b):
    return -(-a // b)


# ---------------------------------------------------------------------------
# Kernels
# ---------------------------------------------------------------------------
def resnet_resident_kernel(x_ref, w_in_ref, b_in_ref, w_h_ref, b_h_ref,
                           w_out_ref, b_out_ref, o_ref, h_ref, *,
                           n_res, activation, unroll_threshold=4):
    """All weights resident in VMEM; 1-D batch grid ("parallel")."""
    act = _activation(activation)
    cdt = w_in_ref.dtype  # matmul operand dtype (bf16); accumulation is f32

    # input layer: (TB, Din) @ (Din, N) + (1, N); activation in f32
    h0 = jnp.dot(x_ref[...], w_in_ref[...], preferred_element_type=jnp.float32)
    h_ref[...] = act(h0 + b_in_ref[...])

    # residual hidden block: h = act(h @ W_i + b_i) + h   (h stays f32, in VMEM)
    def block(i):
        h = h_ref[...]
        z = jnp.dot(h.astype(cdt), w_h_ref[i],
                    preferred_element_type=jnp.float32) + b_h_ref[i]
        h_ref[...] = act(z) + h

    if n_res > unroll_threshold:
        # bounded unroll keeps LLO scheduling visibility without keeping many
        # (tb, N) f32 temporaries live at once
        def body(i, carry):
            block(i)
            return carry
        lax.fori_loop(0, n_res, body, 0, unroll=2)
    else:
        for i in range(n_res):
            block(i)

    out = jnp.dot(h_ref[...].astype(cdt), w_out_ref[...],
                  preferred_element_type=jnp.float32) + b_out_ref[...]
    o_ref[...] = out.astype(o_ref.dtype)


def resnet_stream_kernel(x_ref, w_in_ref, b_in_ref, w_h_ref, b_h_ref,
                         w_out_ref, b_out_ref, o_ref, h_ref, *, activation):
    """Hidden weights streamed over the second ("arbitrary") grid axis.

    h_ref (VMEM scratch) carries the activations across the layer axis; the
    output block is resident across that axis and only written on the last
    layer step (standard accumulator pattern).
    """
    act = _activation(activation)
    cdt = w_in_ref.dtype
    k = pl.program_id(1)

    @pl.when(k == 0)
    def _():
        h0 = jnp.dot(x_ref[...], w_in_ref[...],
                     preferred_element_type=jnp.float32)
        h_ref[...] = act(h0 + b_in_ref[...])

    # residual block k: h = act(h @ W_k + b_k) + h
    h = h_ref[...]
    z = jnp.dot(h.astype(cdt), w_h_ref[0],
                preferred_element_type=jnp.float32) + b_h_ref[0]
    h_ref[...] = act(z) + h

    @pl.when(k == pl.num_programs(1) - 1)
    def _():
        out = jnp.dot(h_ref[...].astype(cdt), w_out_ref[...],
                      preferred_element_type=jnp.float32) + b_out_ref[...]
        o_ref[...] = out.astype(o_ref.dtype)


# ---------------------------------------------------------------------------
# Wrapper
# ---------------------------------------------------------------------------
def _vmem_budget_bytes():
    """Generation-aware usable VMEM: ~80% of physical (headroom for compiler
    internal scratch and the double-buffered I/O tiles)."""
    try:
        cap = pltpu.get_tpu_info().vmem_capacity_bytes
    except Exception:  # hardware query unavailable -> assume smallest gen (v7x)
        cap = 64 * 1024 * 1024
    return int(cap * 0.8)


def _choose_batch_tile(B, tb_max):
    """Megacore-aware, low-padding batch tile.

    >= 2 tiles whenever B allows (both v7x TensorCores busy), and the tile is
    sized from ceil(B / n_tiles) so padding waste stays small even for awkward
    batch sizes (instead of round_up(B, tb_max))."""
    tb_max = max(8, _round_up(tb_max, 8))
    n_tiles = max(2 if B > 8 else 1, _cdiv(B, tb_max))
    tb = _round_up(_cdiv(B, n_tiles), 8)
    return tb, tb * n_tiles, n_tiles


def _resident_footprint_bytes(tb, d_in_p, N_p, d_out_p, n_res, op_bytes):
    """Estimated VMEM footprint of the resident-weights mode (Pallas
    double-buffers every BlockSpec-managed operand by default)."""
    n_w = max(n_res, 1)
    w = (d_in_p * N_p + n_w * N_p * N_p + N_p * d_out_p) * op_bytes
    b = ((1 + n_w) * N_p + d_out_p) * 4
    io = tb * d_in_p * op_bytes + tb * d_out_p * 4
    h = tb * N_p * 4
    return 2 * (w + b + io) + h


def resnet_forward(x, params, *, n_hidden_layers, activation="relu",
                   tb=256, compute_dtype=jnp.bfloat16, mode="auto"):
    """x: (B, input_dim) float32. Returns (B, output_dim) float32."""
    w_in, b_in, w_h, b_h, w_out, b_out = params
    B, d_in = x.shape
    N = w_in.shape[1]
    d_out = w_out.shape[1]
    f32 = jnp.float32
    op_bytes = jnp.dtype(compute_dtype).itemsize

    # lane-dense padded feature dims (multiples of 128 on the lane axis)
    d_in_p = _round_up(d_in, 128)
    N_p = _round_up(N, 128)
    d_out_p = _round_up(d_out, 128)

    n_res = n_hidden_layers - 1
    n_w = max(n_res, 1)  # keep a dummy layer dim when n_hidden_layers == 1
    budget = _vmem_budget_bytes()

    tb_p, B_p, n_tiles = _choose_batch_tile(B, tb)
    footprint = _resident_footprint_bytes(tb_p, d_in_p, N_p, d_out_p,
                                          n_res, op_bytes)

    if mode == "auto":
        use_stream = n_res >= 1 and footprint > 0.7 * budget
    elif mode == "stream":
        if n_res < 1:
            raise ValueError("stream mode requires n_hidden_layers >= 2")
        use_stream = True
    elif mode == "resident":
        use_stream = False
    else:
        raise ValueError(f"unknown mode {mode!r}")

    if use_stream:
        # Bigger batch tile so each streamed (N_p, N_p) weight DMA hides under
        # that layer's matmul (per-layer FLOPs scale with tb, the DMA doesn't).
        # TODO(synk): per-generation tb tuning (v7x's 3.2 TB/s HBM needs less).
        tb_p, B_p, n_tiles = _choose_batch_tile(B, max(tb, 512))

    # ---- padded operands -------------------------------------------------
    def pad2(a, r, c):
        return jnp.pad(a, ((0, r - a.shape[0]), (0, c - a.shape[1])))

    x_p = pad2(x, B_p, d_in_p).astype(compute_dtype)
    w_in_p = pad2(w_in, d_in_p, N_p).astype(compute_dtype)
    b_in_p = pad2(b_in, 1, N_p).astype(f32)
    if n_res > 0:
        w_h_p = jnp.pad(w_h, ((0, 0), (0, N_p - N), (0, N_p - N))).astype(compute_dtype)
        b_h_p = jnp.pad(b_h, ((0, 0), (0, 0), (0, N_p - N))).astype(f32)
    else:
        w_h_p = jnp.zeros((1, N_p, N_p), compute_dtype)  # never read
        b_h_p = jnp.zeros((1, 1, N_p), f32)
    w_out_p = pad2(w_out, N_p, d_out_p).astype(compute_dtype)
    b_out_p = pad2(b_out, 1, d_out_p).astype(f32)

    args = (x_p, w_in_p, b_in_p, w_h_p, b_h_p, w_out_p, b_out_p)

    # ---- cost estimate (padded shapes) -----------------------------------
    flops = 2 * B_p * (d_in_p * N_p + n_res * N_p * N_p + N_p * d_out_p)
    transcendentals = 0 if activation == "relu" else B_p * N_p * n_hidden_layers
    bytes_accessed = (sum(int(a.size) * a.dtype.itemsize for a in args)
                      + B_p * d_out_p * 4)
    cost = pl.CostEstimate(flops=flops, transcendentals=transcendentals,
                           bytes_accessed=bytes_accessed)

    vmem_limit = budget

    # ---- build & run -------------------------------------------------------
    if not use_stream:
        kernel = functools.partial(resnet_resident_kernel,
                                   n_res=n_res, activation=activation)

        def const_spec(shape):
            nd = len(shape)
            return pl.BlockSpec(shape, lambda i, nd=nd: (0,) * nd)

        out_p = pl.pallas_call(
            kernel,
            out_shape=jax.ShapeDtypeStruct((B_p, d_out_p), f32),
            grid_spec=pltpu.PrefetchScalarGridSpec(
                num_scalar_prefetch=0,
                grid=(n_tiles,),
                in_specs=[
                    pl.BlockSpec((tb_p, d_in_p), lambda i: (i, 0)),  # x tile
                    const_spec((d_in_p, N_p)),                       # W_in
                    const_spec((1, N_p)),                            # b_in
                    const_spec((n_w, N_p, N_p)),                     # W_hidden
                    const_spec((n_w, 1, N_p)),                       # b_hidden
                    const_spec((N_p, d_out_p)),                      # W_out
                    const_spec((1, d_out_p)),                        # b_out
                ],
                out_specs=pl.BlockSpec((tb_p, d_out_p), lambda i: (i, 0)),
                scratch_shapes=[pltpu.VMEM((tb_p, N_p), f32)],       # h
            ),
            compiler_params=pltpu.CompilerParams(
                dimension_semantics=("parallel",),
                vmem_limit_bytes=vmem_limit),
            cost_estimate=cost,
        )(*args)
    else:
        kernel = functools.partial(resnet_stream_kernel, activation=activation)

        def const_spec(shape):
            nd = len(shape)
            return pl.BlockSpec(shape, lambda i, k, nd=nd: (0,) * nd)

        out_p = pl.pallas_call(
            kernel,
            out_shape=jax.ShapeDtypeStruct((B_p, d_out_p), f32),
            grid_spec=pltpu.PrefetchScalarGridSpec(
                num_scalar_prefetch=0,
                grid=(n_tiles, n_res),
                in_specs=[
                    pl.BlockSpec((tb_p, d_in_p), lambda i, k: (i, 0)),     # x
                    const_spec((d_in_p, N_p)),                             # W_in
                    const_spec((1, N_p)),                                  # b_in
                    pl.BlockSpec((1, N_p, N_p), lambda i, k: (k, 0, 0)),   # W_h[k]
                    pl.BlockSpec((1, 1, N_p), lambda i, k: (k, 0, 0)),     # b_h[k]
                    const_spec((N_p, d_out_p)),                            # W_out
                    const_spec((1, d_out_p)),                              # b_out
                ],
                out_specs=pl.BlockSpec((tb_p, d_out_p), lambda i, k: (i, 0)),
                scratch_shapes=[pltpu.VMEM((tb_p, N_p), f32)],             # h
            ),
            compiler_params=pltpu.CompilerParams(
                dimension_semantics=("parallel", "arbitrary"),
                vmem_limit_bytes=vmem_limit),
            cost_estimate=cost,
        )(*args)

    return out_p[:B, :d_out]


# ---------------------------------------------------------------------------
# Init + references
# ---------------------------------------------------------------------------
def init_params(key, input_dim, output_dim, n_hidden_layers, neurons):
    """Deterministic synthetic init (uniform, roughly PyTorch Linear scale)."""
    ks = jax.random.split(key, 6)

    def lin(kw, kb, fan_in, fan_out):
        bound = 1.0 / jnp.sqrt(fan_in)
        w = jax.random.uniform(kw, (fan_in, fan_out), jnp.float32, -bound, bound)
        b = jax.random.uniform(kb, (1, fan_out), jnp.float32, -bound, bound)
        return w, b

    w_in, b_in = lin(ks[0], ks[1], input_dim, neurons)
    n_h = max(n_hidden_layers - 1, 1)
    bound = 1.0 / jnp.sqrt(neurons)
    w_h = jax.random.uniform(ks[2], (n_h, neurons, neurons), jnp.float32, -bound, bound)
    b_h = jax.random.uniform(ks[3], (n_h, 1, neurons), jnp.float32, -bound, bound)
    w_out, b_out = lin(ks[4], ks[5], neurons, output_dim)
    return w_in, b_in, w_h, b_h, w_out, b_out


def resnet_reference(x, params, *, n_hidden_layers, activation="relu"):
    """Pure-JAX f32 reference mirroring the PyTorch forward."""
    act = _activation(activation)
    w_in, b_in, w_h, b_h, w_out, b_out = params
    h = act(x @ w_in + b_in)
    for i in range(n_hidden_layers - 1):
        h = act(h @ w_h[i] + b_h[i]) + h
    return h @ w_out + b_out


def resnet_reference_bf16ops(x, params, *, n_hidden_layers, activation="relu"):
    """Reference with bf16-rounded matmul operands + f32 accumulation (matches kernel)."""
    act = _activation(activation)
    w_in, b_in, w_h, b_h, w_out, b_out = params
    r = lambda a: a.astype(jnp.bfloat16).astype(jnp.float32)
    h = act(r(x) @ r(w_in) + b_in)
    for i in range(n_hidden_layers - 1):
        h = act(r(h) @ r(w_h[i]) + b_h[i]) + h
    return r(h) @ r(w_out) + b_out


# ---------------------------------------------------------------------------
if __name__ == "__main__":
    root_key = jax.random.PRNGKey(0)

    def run_case(name, *, input_dim, output_dim, n_hidden_layers, neurons,
                 batch, activation, mode, atol, rtol, seed):
        kx, kp = jax.random.split(jax.random.fold_in(root_key, seed))
        x = jax.random.normal(kx, (batch, input_dim), jnp.float32)
        params = init_params(kp, input_dim, output_dim, n_hidden_layers, neurons)

        out = resnet_forward(x, params, n_hidden_layers=n_hidden_layers,
                             activation=activation, mode=mode)
        out = jax.block_until_ready(out)
        assert out.shape == (batch, output_dim), f"{name}: bad shape {out.shape}"

        # tight check vs a reference using the same bf16 operand rounding
        ref_bf = resnet_reference_bf16ops(x, params, n_hidden_layers=n_hidden_layers,
                                          activation=activation)
        assert jnp.allclose(out, ref_bf, atol=atol, rtol=rtol), \
            f"{name}: mismatch vs bf16-op reference"

        # loose sanity check vs the full-f32 reference
        ref32 = resnet_reference(x, params, n_hidden_layers=n_hidden_layers,
                                 activation=activation)
        assert jnp.allclose(out, ref32, atol=max(atol, 5e-2), rtol=max(rtol, 5e-2)), \
            f"{name}: mismatch vs f32 reference"

    # 1) resident mode, Python-unrolled hidden loop (typical module config)
    run_case("resident_relu", input_dim=4, output_dim=2, n_hidden_layers=3,
             neurons=128, batch=512, activation="relu", mode="auto",
             atol=2e-3, rtol=2e-3, seed=0)

    # 2) resident mode, fori_loop(unroll=2) path (n_res > unroll_threshold)
    run_case("resident_deep_tanh", input_dim=4, output_dim=2, n_hidden_layers=8,
             neurons=128, batch=128, activation="tanh", mode="resident",
             atol=1e-2, rtol=1e-2, seed=1)

    # 3) streamed-weights mode (second "arbitrary" grid axis over hidden layers)
    run_case("stream_sigmoid", input_dim=4, output_dim=2, n_hidden_layers=4,
             neurons=128, batch=64, activation="sigmoid", mode="stream",
             atol=1e-2, rtol=1e-2, seed=2)

    print("KERNEL_OK")
</pallas_src>

<mosaic_0001>
module attributes {stable_mosaic.version = 11 : i64} {
  func.func @resnet_resident_kernel(%arg0: i32, %arg1: memref<256x128xbf16, #tpu.memory_space<vmem>>, %arg2: memref<128x128xbf16, #tpu.memory_space<vmem>>, %arg3: memref<1x128xf32, #tpu.memory_space<vmem>>, %arg4: memref<2x128x128xbf16, #tpu.memory_space<vmem>>, %arg5: memref<2x1x128xf32, #tpu.memory_space<vmem>>, %arg6: memref<128x128xbf16, #tpu.memory_space<vmem>>, %arg7: memref<1x128xf32, #tpu.memory_space<vmem>>, %arg8: memref<256x128xf32, #tpu.memory_space<vmem>>, %arg9: memref<256x128xf32, #tpu.memory_space<vmem>>) attributes {dimension_semantics = [#tpu.dimension_semantics<parallel>], iteration_bounds = array<i64: 2>, scalar_prefetch = 0 : i64, scratch_operands = 1 : i64, tpu.core_type = #tpu.core_type<tc>, window_params = [{transform_indices = @transform_0, window_bounds = array<i64: 256, 128>}, {pipeline_mode = #tpu.pipeline_mode<synchronous>, transform_indices = @transform_1, window_bounds = array<i64: 128, 128>}, {pipeline_mode = #tpu.pipeline_mode<synchronous>, transform_indices = @transform_2, window_bounds = array<i64: 1, 128>}, {pipeline_mode = #tpu.pipeline_mode<synchronous>, transform_indices = @transform_3, window_bounds = array<i64: 2, 128, 128>}, {pipeline_mode = #tpu.pipeline_mode<synchronous>, transform_indices = @transform_4, window_bounds = array<i64: 2, 1, 128>}, {pipeline_mode = #tpu.pipeline_mode<synchronous>, transform_indices = @transform_5, window_bounds = array<i64: 128, 128>}, {pipeline_mode = #tpu.pipeline_mode<synchronous>, transform_indices = @transform_6, window_bounds = array<i64: 1, 128>}, {transform_indices = @transform_7, window_bounds = array<i64: 256, 128>}]} {
    %c0 = arith.constant 0 : index
    %c0_0 = arith.constant 0 : index
    %0 = vector.load %arg1[%c0, %c0_0] : memref<256x128xbf16, #tpu.memory_space<vmem>>, vector<256x128xbf16>
    %c0_1 = arith.constant 0 : index
    %c0_2 = arith.constant 0 : index
    %1 = vector.load %arg2[%c0_1, %c0_2] : memref<128x128xbf16, #tpu.memory_space<vmem>>, vector<128x128xbf16>
    %cst = arith.constant dense<0.000000e+00> : vector<256x128xf32>
    %2 = tpu.matmul %0, %1, %cst {dimension_numbers = #tpu.dot_dimension_numbers<[1], [0], [0], [1], [0, 0, 1, 1], [], []>} : vector<256x128xbf16>, vector<128x128xbf16>, vector<256x128xf32> -> vector<256x128xf32>
    %c0_3 = arith.constant 0 : index
    %c0_4 = arith.constant 0 : index
    %3 = vector.load %arg3[%c0_3, %c0_4] : memref<1x128xf32, #tpu.memory_space<vmem>>, vector<1x128xf32>
    %4 = vector.broadcast %3 : vector<1x128xf32> to vector<256x128xf32>
    %5 = arith.addf %2, %4 : vector<256x128xf32>
    %cst_5 = arith.constant 0.000000e+00 : f32
    %6 = vector.broadcast %cst_5 : f32 to vector<256x128xf32>
    %7 = arith.maximumf %5, %6 : vector<256x128xf32>
    %c0_6 = arith.constant 0 : index
    %c0_7 = arith.constant 0 : index
    %8 = vector.load %arg9[%c0_6, %c0_7] : memref<256x128xf32, #tpu.memory_space<vmem>>, vector<256x128xf32>
    tpu.vector_store %arg9[%c0_6, %c0_7], %7 {strides = array<i32>} : memref<256x128xf32, #tpu.memory_space<vmem>>, vector<256x128xf32>,
    %c0_8 = arith.constant 0 : index
    %c0_9 = arith.constant 0 : index
    %9 = vector.load %arg9[%c0_8, %c0_9] : memref<256x128xf32, #tpu.memory_space<vmem>>, vector<256x128xf32>
    %10 = arith.truncf %9 : vector<256x128xf32> to vector<256x128xbf16>
    %c0_10 = arith.constant 0 : index
    %c0_11 = arith.constant 0 : index
    %c0_12 = arith.constant 0 : index
    %11 = vector.load %arg4[%c0_10, %c0_11, %c0_12] : memref<2x128x128xbf16, #tpu.memory_space<vmem>>, vector<1x128x128xbf16>
    %12 = vector.shape_cast %11 : vector<1x128x128xbf16> to vector<128x128xbf16>
    %cst_13 = arith.constant dense<0.000000e+00> : vector<256x128xf32>
    %13 = tpu.matmul %10, %12, %cst_13 {dimension_numbers = #tpu.dot_dimension_numbers<[1], [0], [0], [1], [0, 0, 1, 1], [], []>} : vector<256x128xbf16>, vector<128x128xbf16>, vector<256x128xf32> -> vector<256x128xf32>
    %c0_14 = arith.constant 0 : index
    %c0_15 = arith.constant 0 : index
    %c0_16 = arith.constant 0 : index
    %14 = vector.load %arg5[%c0_14, %c0_15, %c0_16] : memref<2x1x128xf32, #tpu.memory_space<vmem>>, vector<1x1x128xf32>
    %15 = vector.shape_cast %14 : vector<1x1x128xf32> to vector<1x128xf32>
    %16 = vector.broadcast %15 : vector<1x128xf32> to vector<256x128xf32>
    %17 = arith.addf %13, %16 : vector<256x128xf32>
    %cst_17 = arith.constant 0.000000e+00 : f32
    %18 = vector.broadcast %cst_17 : f32 to vector<256x128xf32>
    %19 = arith.maximumf %17, %18 : vector<256x128xf32>
    %20 = arith.addf %19, %9 : vector<256x128xf32>
    %c0_18 = arith.constant 0 : index
    %c0_19 = arith.constant 0 : index
    %21 = vector.load %arg9[%c0_18, %c0_19] : memref<256x128xf32, #tpu.memory_space<vmem>>, vector<256x128xf32>
    tpu.vector_store %arg9[%c0_18, %c0_19], %20 {strides = array<i32>} : memref<256x128xf32, #tpu.memory_space<vmem>>, vector<256x128xf32>,
    %c0_20 = arith.constant 0 : index
    %c0_21 = arith.constant 0 : index
    %22 = vector.load %arg9[%c0_20, %c0_21] : memref<256x128xf32, #tpu.memory_space<vmem>>, vector<256x128xf32>
    %23 = arith.truncf %22 : vector<256x128xf32> to vector<256x128xbf16>
    %c1 = arith.constant 1 : index
    %c0_22 = arith.constant 0 : index
    %c0_23 = arith.constant 0 : index
    %24 = vector.load %arg4[%c1, %c0_22, %c0_23] : memref<2x128x128xbf16, #tpu.memory_space<vmem>>, vector<1x128x128xbf16>
    %25 = vector.shape_cast %24 : vector<1x128x128xbf16> to vector<128x128xbf16>
    %cst_24 = arith.constant dense<0.000000e+00> : vector<256x128xf32>
    %26 = tpu.matmul %23, %25, %cst_24 {dimension_numbers = #tpu.dot_dimension_numbers<[1], [0], [0], [1], [0, 0, 1, 1], [], []>} : vector<256x128xbf16>, vector<128x128xbf16>, vector<256x128xf32> -> vector<256x128xf32>
    %c1_25 = arith.constant 1 : index
    %c0_26 = arith.constant 0 : index
    %c0_27 = arith.constant 0 : index
    %27 = vector.load %arg5[%c1_25, %c0_26, %c0_27] : memref<2x1x128xf32, #tpu.memory_space<vmem>>, vector<1x1x128xf32>
    %28 = vector.shape_cast %27 : vector<1x1x128xf32> to vector<1x128xf32>
    %29 = vector.broadcast %28 : vector<1x128xf32> to vector<256x128xf32>
    %30 = arith.addf %26, %29 : vector<256x128xf32>
    %cst_28 = arith.constant 0.000000e+00 : f32
    %31 = vector.broadcast %cst_28 : f32 to vector<256x128xf32>
    %32 = arith.maximumf %30, %31 : vector<256x128xf32>
    %33 = arith.addf %32, %22 : vector<256x128xf32>
    %c0_29 = arith.constant 0 : index
    %c0_30 = arith.constant 0 : index
    %34 = vector.load %arg9[%c0_29, %c0_30] : memref<256x128xf32, #tpu.memory_space<vmem>>, vector<256x128xf32>
    tpu.vector_store %arg9[%c0_29, %c0_30], %33 {strides = array<i32>} : memref<256x128xf32, #tpu.memory_space<vmem>>, vector<256x128xf32>,
    %c0_31 = arith.constant 0 : index
    %c0_32 = arith.constant 0 : index
    %35 = vector.load %arg9[%c0_31, %c0_32] : memref<256x128xf32, #tpu.memory_space<vmem>>, vector<256x128xf32>
    %36 = arith.truncf %35 : vector<256x128xf32> to vector<256x128xbf16>
    %c0_33 = arith.constant 0 : index
    %c0_34 = arith.constant 0 : index
    %37 = vector.load %arg6[%c0_33, %c0_34] : memref<128x128xbf16, #tpu.memory_space<vmem>>, vector<128x128xbf16>
    %cst_35 = arith.constant dense<0.000000e+00> : vector<256x128xf32>
    %38 = tpu.matmul %36, %37, %cst_35 {dimension_numbers = #tpu.dot_dimension_numbers<[1], [0], [0], [1], [0, 0, 1, 1], [], []>} : vector<256x128xbf16>, vector<128x128xbf16>, vector<256x128xf32> -> vector<256x128xf32>
    %c0_36 = arith.constant 0 : index
    %c0_37 = arith.constant 0 : index
    %39 = vector.load %arg7[%c0_36, %c0_37] : memref<1x128xf32, #tpu.memory_space<vmem>>, vector<1x128xf32>
    %40 = vector.broadcast %39 : vector<1x128xf32> to vector<256x128xf32>
    %41 = arith.addf %38, %40 : vector<256x128xf32>
    %c0_38 = arith.constant 0 : index
    %c0_39 = arith.constant 0 : index
    %42 = vector.load %arg8[%c0_38, %c0_39] : memref<256x128xf32, #tpu.memory_space<vmem>>, vector<256x128xf32>
    tpu.vector_store %arg8[%c0_38, %c0_39], %41 {strides = array<i32>} : memref<256x128xf32, #tpu.memory_space<vmem>>, vector<256x128xf32>,
    return
  }
  func.func @transform_0(%arg0: i32) -> (i32, i32) {
    %c0_i32 = arith.constant 0 : i32
    %c0_i32_0 = arith.constant 0 : i32
    return %arg0, %c0_i32 : i32, i32
  }
  func.func @transform_1(%arg0: i32) -> (i32, i32) {
    %c0_i32 = arith.constant 0 : i32
    %c0_i32_0 = arith.constant 0 : i32
    %c0_i32_1 = arith.constant 0 : i32
    return %c0_i32, %c0_i32_0 : i32, i32
  }
  func.func @transform_2(%arg0: i32) -> (i32, i32) {
    %c0_i32 = arith.constant 0 : i32
    %c0_i32_0 = arith.constant 0 : i32
    %c0_i32_1 = arith.constant 0 : i32
    return %c0_i32, %c0_i32_0 : i32, i32
  }
  func.func @transform_3(%arg0: i32) -> (i32, i32, i32) {
    %c0_i32 = arith.constant 0 : i32
    %c0_i32_0 = arith.constant 0 : i32
    %c0_i32_1 = arith.constant 0 : i32
    %c0_i32_2 = arith.constant 0 : i32
    return %c0_i32, %c0_i32_0, %c0_i32_1 : i32, i32, i32
  }
  func.func @transform_4(%arg0: i32) -> (i32, i32, i32) {
    %c0_i32 = arith.constant 0 : i32
    %c0_i32_0 = arith.constant 0 : i32
    %c0_i32_1 = arith.constant 0 : i32
    %c0_i32_2 = arith.constant 0 : i32
    return %c0_i32, %c0_i32_0, %c0_i32_1 : i32, i32, i32
  }
  func.func @transform_5(%arg0: i32) -> (i32, i32) {
    %c0_i32 = arith.constant 0 : i32
    %c0_i32_0 = arith.constant 0 : i32
    %c0_i32_1 = arith.constant 0 : i32
    return %c0_i32, %c0_i32_0 : i32, i32
  }
  func.func @transform_6(%arg0: i32) -> (i32, i32) {
    %c0_i32 = arith.constant 0 : i32
    %c0_i32_0 = arith.constant 0 : i32
    %c0_i32_1 = arith.constant 0 : i32
    return %c0_i32, %c0_i32_0 : i32, i32
  }
  func.func @transform_7(%arg0: i32) -> (i32, i32) {
    %c0_i32 = arith.constant 0 : i32
    %c0_i32_0 = arith.constant 0 : i32
    return %arg0, %c0_i32 : i32, i32
  }
}

</mosaic_0001>

<bundles_post_ra>
// kernel: tpu_custom_call.1
= control target key start
LH: loop header
LB: loop body
LE: loop exit
PB: predicated region body
PF: predicated region fallthrough
CT: control target
= control target key end

     0   :  { %12 = vsyncpa [#allocation4], 0  ;;  %s3506_s0 = inlined_call_operand.hbm [shape: bf16[512,128], index: 0, kind: input, shape index: {}]   ;;  %s3507_s1 = inlined_call_operand.hbm [shape: bf16[128,128], index: 1, kind: input, shape index: {}]   ;;  %s3508_s2 = inlined_call_operand.vmem [shape: f32[1,128], index: 2, kind: input, shape index: {}]   ;;  %s3509_s3 = inlined_call_operand.hbm [shape: bf16[2,128,128], index: 3, kind: input, shape index: {}]   ;;  %s3510_s4 = inlined_call_operand.vmem [shape: f32[2,1,128], index: 4, kind: input, shape index: {}]   ;;  %s3511_s5 = inlined_call_operand.hbm [shape: bf16[128,128], index: 5, kind: input, shape index: {}]   ;;  %s3512_s6 = inlined_call_operand.vmem [shape: f32[1,128], index: 6, kind: input, shape index: {}]   ;;  %s3513_s7 = inlined_call_operand.hbm [shape: f32[512,128], index: 7, kind: output, shape index: {}]  }
   0x1   :  { %14 = vsyncpa [#allocation4 + $0x1], 0 }
   0x2   :  { %15 = vsyncpa [#allocation7], 0 }
   0x3   :  { %16 = vsyncpa [#allocation10], 0 }
   0x4   :  { %17 = vsyncpa [#allocation5], 0 }
   0x5   :  { %19 = vsyncpa [#allocation5 + $0x1], 0  ;;  %s2681_s24 = smov 0   ;;  %s2683_s25 = smov 0  }
   0x6   :  { %s2685_s26 = smov 0   ;;  %s2687_s27 = smov 0  }
   0x7 LB: > { %s2702_s28 = sadd.s32 4294967295, %s2630_s27   ;;  %s1950_s29 = sadd.s32 4294967294, %s2630_s27   ;;  %s2630_s27 = sphi %s2687_s27, %s3567_s27   ;;  %s2626_s26 = sphi %s2685_s26, %s3566_s26   ;;  %s2622_s25 = sphi %s2683_s25, %s3565_s25   ;;  %s2618_s24 = sphi %s2681_s24, %s3564_s24  }
   0x8   : > { %p45_p0 = scmp.ne.s32.totalorder %s2622_s25, %s2618_s24  ;;  %p3514_p1 = scmp.eq.s32.totalorder %s2702_s28, 0 }
   0x9   : > { %p201_p3 = scmp.eq.s32.totalorder %s1950_s29, 1  ;;  %p1951_p5 = scmp.ge.s32.totalorder %s2630_s27, 1 }
   0xa   : > { %p2711_p4 = por %p3514_p1, %p45_p0  ;;  %p208_p7 = scmp.lt.s32.totalorder %s2630_s27, 3 }
   0xb   : > { %p2716_p6 = por %p201_p3, %p45_p0  ;;  %s2632_s10 = smov [#allocation6]  }
   0xc   : > { %s3532_s30 = scalar_select %p2711_p4, 1, 0 }
   0xd   : > { %s3533_s8 = scalar_select %p2716_p6, 1, 0 }
   0xe   : > { %p2721_p8 = pnand %p1951_p5, %p208_p7  ;;  %s220_s11 = sshll.u32 %s2632_s10, 4  ;;  %s2725_s11 = int_to_ptr.vmem [resolvable:$true] %s220_s11 }
   0xf   : > { %3534 = sst [smem:[#allocation16_spill]] %s3533_s8  ;;  %s2633_s13 = smov [#allocation8]  }
  0x10   : > { %s3535_s9 = scalar_select %p2721_p8, 1, 0 }
  0x11   : > { %p2329_p9 = pneg %p2721_p8  ;;  %s236_s14 = sshll.u32 %s2633_s13, 4  ;;  %s2736_s14 = int_to_ptr.vmem [resolvable:$true] %s236_s14 }
  0x12   : > { %s2634_s15 = smov [#allocation9]   ;;  %s2442_s19 = scalar_lea.hbm %s3507_s1, 1024 }
  0x13   : > { %p2732_p11 = pnand %p2329_p9, %p3514_p1  ;;  %s2738_s16 = sshll.u32 %s2634_s15, 4  ;;  %s253_s16 = int_to_ptr.vmem [resolvable:$true] %s2738_s16 }
  0x14   : > { %p2443_p12 = scmp.ne.s32.totalorder %s3507_s1, %s2442_s19  ;;  %p2449_p5 = scmp.lt.u32.totalorder %s2442_s19, %s3507_s1 }
  0x15   : > { %p2748_p13 = pneg %p2732_p11 }
  0x17   : > { %p2445_p0 = pnand %p2748_p13, %p2443_p12 }
  0x19   : > { %p2446_p3 = pneg %p2445_p0 }
  0x1b   : > { %p2451_p7 = pnand %p2449_p5, %p2446_p3 }
  0x1d   : > { %2454 = shalt.err (!%p2451_p7)
}
  0x1e   : > { %s2455_s10 = scalar_lea.vmem %s2725_s11, 1024  ;;  %p2463_p2 = scmp.lt.s32.totalorder %s2725_s11, %s2725_s11 }
  0x1f   : > { %p2456_p9 = scmp.ne.s32.totalorder %s2725_s11, %s2455_s10  ;;  %p2464_p6 = scmp.lt.s32.totalorder %s2455_s10, %s2455_s10 }
  0x21   : > { %p2458_p10 = pnand %p2456_p9, %p2748_p13  ;;  %p2465_p12 = por %p2464_p6, %p2463_p2 }
  0x23   : > { %p2459_p1 = pneg %p2458_p10 }
  0x25   : > { %p2466_p0 = pnand %p2465_p12, %p2459_p1 }
  0x27   : > { %2469 = shalt.err (!%p2466_p0)
}
  0x28   : > { %s2635_s13 = smov 64   ;;  %s2636_s15 = smov 4  }
  0x29   : > { %2332 = dma.hbm_to_vmem [thread:$0]  (!%p2732_p11), %s3507_s1, 1024, %s2725_s11, [#allocation7], %s2635_s13, %s2635_s13, %s2636_s15  }
  0x2a   : > { %s2470_s21 = scalar_lea.hbm %s3509_s3, 2048 }
  0x2b   : > { %p2471_p1 = scmp.ne.s32.totalorder %s3509_s3, %s2470_s21  ;;  %p2477_p10 = scmp.lt.u32.totalorder %s2470_s21, %s3509_s3 }
  0x2d   : > { %p2473_p2 = pnand %p2471_p1, %p2748_p13 }
  0x2f   : > { %p2474_p6 = pneg %p2473_p2 }
  0x31   : > { %p2479_p3 = pnand %p2477_p10, %p2474_p6 }
  0x33   : > { %2482 = shalt.err (!%p2479_p3)
}
  0x34   : > { %s2483_s11 = scalar_lea.vmem %s2736_s14, 2048  ;;  %p2491_p12 = scmp.lt.s32.totalorder %s2736_s14, %s2736_s14 }
  0x35   : > { %p2484_p5 = scmp.ne.s32.totalorder %s2736_s14, %s2483_s11  ;;  %p2492_p0 = scmp.lt.s32.totalorder %s2483_s11, %s2483_s11 }
  0x37   : > { %p2486_p7 = pnand %p2484_p5, %p2748_p13  ;;  %p2493_p1 = por %p2492_p0, %p2491_p12 }
  0x39   : > { %p2487_p9 = pneg %p2486_p7 }
  0x3b   : > { %p2494_p2 = pnand %p2493_p1, %p2487_p9 }
  0x3d   : > { %2497 = shalt.err (!%p2494_p2)
}
  0x3e   : > { %2335 = dma.hbm_to_vmem [thread:$0]  (!%p2732_p11), %s3509_s3, 2048, %s2736_s14, [#allocation7], %s2635_s13, %s2635_s13, %s2636_s15  }
  0x3f   : > { %s2498_s20 = scalar_lea.hbm %s3511_s5, 1024 }
  0x40   : > { %p2499_p6 = scmp.ne.s32.totalorder %s3511_s5, %s2498_s20  ;;  %p2505_p5 = scmp.lt.u32.totalorder %s2498_s20, %s3511_s5 }
  0x42   : > { %p2501_p10 = pnand %p2499_p6, %p2748_p13 }
  0x44   : > { %p2502_p3 = pneg %p2501_p10 }
  0x46   : > { %p2507_p7 = pnand %p2505_p5, %p2502_p3 }
  0x48   : > { %2510 = shalt.err (!%p2507_p7)
}
  0x49   : > { %s2511_s11 = scalar_lea.vmem %s253_s16, 1024  ;;  %p2519_p1 = scmp.lt.s32.totalorder %s253_s16, %s253_s16 }
  0x4a   : > { %p2512_p9 = scmp.ne.s32.totalorder %s253_s16, %s2511_s11  ;;  %p2520_p2 = scmp.lt.s32.totalorder %s2511_s11, %s2511_s11 }
  0x4c   : > { %p2514_p12 = pnand %p2512_p9, %p2748_p13  ;;  %p2521_p4 = por %p2520_p2, %p2519_p1 }
  0x4e   : > { %p2515_p0 = pneg %p2514_p12 }
  0x50   : > { %p2522_p8 = pnand %p2521_p4, %p2515_p0 }
  0x52   : > { %2525 = shalt.err (!%p2522_p8)
}
  0x53   : > { %2338 = dma.hbm_to_vmem [thread:$0]  (!%p2732_p11), %s3511_s5, 1024, %s253_s16, [#allocation10], %s2635_s13, %s2635_s13, %s2636_s15  }
  0x54   : > { %s2821_s22 = sadd.s32 1, %s2630_s27   ;;  %s32_s17 = sadd.s32 1, %s2626_s26 }
  0x55   : > { %s29_s12 = ssub.s32 %s2630_s27, %s2821_s22  ;;  %p39_p8 = scmp.ne.s32.totalorder %s2626_s26, %s2622_s25 }
  0x56   : > { %p30_p4 = scmp.eq.s32.totalorder %s29_s12, 0  ;;  %p40_p13 = scmp.eq.s32.totalorder %s2630_s27, 0 }
  0x57   : > { %p2350_p6 = scmp.lt.s32.totalorder %s2630_s27, 2  ;;  %p3538_p3 = scmp.eq.s32.totalorder %s2702_s28, 1 }
  0x58   : > { %s2831_s18 = scalar_select %p30_p4, %s2626_s26, %s32_s17  }
  0x59   : > { %p41_p10 = por %p40_p13, %p39_p8  ;;  %p2835_p5 = por %p3538_p3, %p39_p8 }
  0x5a   : > { %s269_s20 = sand.u32 1, %s2626_s26   ;;  %s2023_s21 = sshll.u32 %s2630_s27, 11 }
  0x5b   : > { %s1956_s16 = sshll.u32 %s269_s20, 7  ;;  %s2844_s10 = scalar_lea.hbm %s3506_s0, %s2023_s21 }
  0x5c   : > { %s273_s11 = scalar_lea.vmem [#allocation3], %s1956_s16  ;;  %p2846_p11 = pnand %p2350_p6, %p41_p10 }
  0x5d   : > { %s280_s14 = sshll.u32 %s273_s11, 4  ;;  %s2852_s12 = scalar_lea.sflag [#allocation4], %s269_s20  ;;  %s2850_s14 = int_to_ptr.vmem [resolvable:$true] %s280_s14 }
  0x5e   : > { %s2526_s17 = scalar_lea.hbm %s2844_s10, 2048  ;;  %p2528_p9 = pneg %p2846_p11 }
  0x5f   : > { %p2527_p7 = scmp.ne.s32.totalorder %s2844_s10, %s2526_s17  ;;  %s2531_s23 = scalar_lea.hbm %s3506_s0, 4096 }
  0x60   : > { %p2532_p1 = scmp.lt.u32.totalorder %s2844_s10, %s3506_s0  ;;  %p2533_p2 = scmp.lt.u32.totalorder %s2531_s23, %s2526_s17 }
  0x61   : > { %p2529_p12 = pnand %p2528_p9, %p2527_p7  ;;  %p2535_p8 = scmp.lt.u32.totalorder %s2526_s17, %s2844_s10 }
  0x62   : > { %p2534_p4 = por %p2533_p2, %p2532_p1 }
  0x63   : > { %p2530_p0 = pneg %p2529_p12 }
  0x64   : > { %p2536_p13 = por %p2535_p8, %p2534_p4 }
  0x66   : > { %p2537_p6 = pnand %p2536_p13, %p2530_p0 }
  0x68   : > { %2540 = shalt.err (!%p2537_p6)
}
  0x69   : > { %s2541_s20 = scalar_lea.vmem %s2850_s14, 2048  ;;  %s2637_s21 = smov [#allocation3]  }
  0x6a   : > { %p2542_p10 = scmp.ne.s32.totalorder %s2850_s14, %s2541_s20  ;;  %s2546_s16 = sshll.u32 %s2637_s21, 4  ;;  %s2547_s16 = int_to_ptr.vmem [resolvable:$false] %s2546_s16 }
  0x6b   : > { %s2548_s29 = scalar_lea.vmem %s2547_s16, 4096  ;;  %p2549_p12 = scmp.lt.s32.totalorder %s2850_s14, %s2547_s16 }
  0x6c   : > { %p2544_p3 = pnand %p2542_p10, %p2528_p9  ;;  %p2550_p1 = scmp.lt.s32.totalorder %s2548_s29, %s2541_s20 }
  0x6e   : > { %p2545_p7 = pneg %p2544_p3  ;;  %p2551_p2 = por %p2550_p1, %p2549_p12 }
  0x70   : > { %p2552_p4 = pnand %p2551_p2, %p2545_p7 }
  0x72   : > { %2555 = shalt.err (!%p2552_p4)
}
  0x73   : > { %2342 = dma.hbm_to_vmem [thread:$0]  (!%p2846_p11), %s2844_s10, 2048, %s2850_s14, %s2852_s12, %s2635_s13, %s2635_s13, %s2636_s15  }
  0x74   : > { %p3541_p9 = scmp.ne.s32.totalorder %s3535_s9, 0 }
  0x75   : > { %s2886_s17 = sand.u32 (!%p3541_p9), 1, %s2622_s25   ;;  %p3542_p0 = scmp.ne.s32.totalorder (!%p3541_p9), %s3532_s30, 0 }
  0x76   : > { %292 = sbr.rel (%p3541_p9) target bundleno = 1124 (0x464), region = 48  ;;  %s1960_s23 = sshll.u32 (!%p3541_p9), %s2886_s17, 7 }
  0x77   : > { %s295_s11 = scalar_lea.sflag (!%p3541_p9), [#allocation4], %s2886_s17  ;;  %s2890_s20 = scalar_lea.vmem (!%p3541_p9), [#allocation3], %s1960_s23 }
  0x7d   : > { %2601 = dma.done.wait (%p3542_p0), %s295_s11, 2048  }
  0x7e   : > { %2603 = vsyncadd (%p3542_p0), %s295_s11, 4294965248  ;;  %p3543_p11 = scmp.eq.s32.totalorder %s2702_s28, 0 }
  0x80   : > { %2605 = dma.done.wait (%p3543_p11), [#allocation7], 3072   ;;  %p3544_p8 = pmov %p3543_p11 }
  0x82   : > { %2607 = vsyncadd (%p3544_p8), [#allocation7], 4294964224  ;;  %p3545_p13 = pmov %p3544_p8 }
  0x83   : > { %p3546_p6 = pmov %p3544_p8 }
  0x84   : > { %2609 = dma.done.wait (%p3545_p13), [#allocation10], 1024  }
  0x85   : > { %2611 = vsyncadd (%p3546_p6), [#allocation10], 4294966272  ;;  %v2394_v0 = vld [vmem:[#allocation6] sm:$0xff]   ;;  %v2395_v1 = vld [vmem:[#allocation6 + $0x8] sm:$0xff]   ;;  %s1964_s8 = sshll.u32 %s2886_s17, 8  ;;  %s2024_s29 = sshll.u32 %s2702_s28, 12 }
  0x86   : > { %2121 = vmatprep.subr.bf16.mxu0 %v2394_v0  ;;  %v2396_v2 = vld [vmem:[#allocation6 + $0x10] sm:$0xff]   ;;  %v2397_v3 = vld [vmem:[#allocation6 + $0x18] sm:$0xff]   ;;  %v2402_v4 = vld [vmem:[%s2890_s20] sm:$0xff]   ;;  %s3391_s16 = scalar_lea.vmem [#allocation11], %s1964_s8  ;;  %s3456_s30 = scalar_lea.hbm %s3513_s7, %s2024_s29 }
  0x87   : > { %2122 = vmatpush3.bf16.msra.mxu0 %v2394_v0  ;;  %2137 = vmatprep.mubr.bf16.mxu0 %v2402_v4  ;;  %v2398_v5 = vld [vmem:[#allocation6 + $0x20] sm:$0xff]   ;;  %v2399_v6 = vld [vmem:[#allocation6 + $0x28] sm:$0xff]   ;;  %v2400_v7 = vld [vmem:[#allocation6 + $0x30] sm:$0xff]   ;;  %s1848_s23 = sshll.u32 %s3391_s16, 4  ;;  %s1835_s28 = scalar_lea.sflag [#allocation5], %s2886_s17  ;;  %s3458_s23 = int_to_ptr.vmem [resolvable:$true] %s1848_s23 }
  0x88   : > { %2123 = vmatprep.subr.bf16.mxu0 %v2395_v1  ;;  %v2401_v8 = vld [vmem:[#allocation6 + $0x38] sm:$0xff]   ;;  %v2418_v9 = vld [vmem:[#allocation8] sm:$0xff]   ;;  %v2419_v10 = vld [vmem:[#allocation8 + $0x8] sm:$0xff]   ;;  %s2556_s9 = scalar_lea.vmem %s3458_s23, 4096  ;;  %s2638_s13 = smov [#allocation11]  }
  0x89   : > { %2169 = vmatprep.subr.bf16.mxu1 %v2418_v9  ;;  %v2403_v11 = vld [vmem:[%s2890_s20 + $0x8] sm:$0xff]   ;;  %v2420_v12 = vld [vmem:[#allocation8 + $0x10] sm:$0xff]   ;;  %v2421_v14 = vld [vmem:[#allocation8 + $0x18] sm:$0xff]   ;;  %p2557_p10 = scmp.ne.s32.totalorder %s3458_s23, %s2556_s9  ;;  %s2560_s15 = sshll.u32 %s2638_s13, 4  ;;  %s2561_s15 = int_to_ptr.vmem [resolvable:$false] %s2560_s15 }
  0x8a   : > { %2170 = vmatpush3.bf16.msra.mxu1 %v2418_v9  ;;  %v2404_v13 = vld [vmem:[%s2890_s20 + $0x10] sm:$0xff]   ;;  %v2422_v15 = vld [vmem:[#allocation8 + $0x20] sm:$0xff]   ;;  %v2405_v16 = vld [vmem:[%s2890_s20 + $0x18] sm:$0xff]   ;;  %s2562_s10 = scalar_lea.vmem %s2561_s15, 8192  ;;  %p2563_p12 = scmp.lt.s32.totalorder %s3458_s23, %s2561_s15 }
  0x8b   : > { %2124 = vmatpush3.bf16.msra.mxu0 %v2395_v1  ;;  %2171 = vmatprep.subr.bf16.mxu1 %v2419_v10  ;;  %v2406_v17 = vld [vmem:[%s2890_s20 + $0x20] sm:$0xff]   ;;  %v2423_v18 = vld [vmem:[#allocation8 + $0x28] sm:$0xff]   ;;  %v2408_v20 = vld [vmem:[%s2890_s20 + $0x30] sm:$0xff]   ;;  %p2558_p3 = pnand %p2557_p10, %p2835_p5  ;;  %p2564_p1 = scmp.lt.s32.totalorder %s2562_s10, %s2556_s9 }
  0x8c   : > { %2125 = vmatprep.subr.bf16.mxu0 %v2396_v2  ;;  %v2407_v19 = vld [vmem:[%s2890_s20 + $0x28] sm:$0xff]   ;;  %v2409_v21 = vld [vmem:[%s2890_s20 + $0x38] sm:$0xff]   ;;  %v2410_v22 = vld [vmem:[%s2890_s20 + $0x40] sm:$0xff]  }
  0x8d   : > { %v2411_v23 = vld [vmem:[%s2890_s20 + $0x48] sm:$0xff]   ;;  %v2412_v24 = vld [vmem:[%s2890_s20 + $0x50] sm:$0xff]   ;;  %v2413_v25 = vld [vmem:[%s2890_s20 + $0x58] sm:$0xff]   ;;  %p2559_p7 = pneg %p2558_p3  ;;  %p2565_p2 = por %p2564_p1, %p2563_p12 }
  0x8e   : > { %2172 = vmatpush3.bf16.msra.mxu1 %v2419_v10  ;;  %v2414_v26 = vld [vmem:[%s2890_s20 + $0x60] sm:$0xff]   ;;  %v2415_v27 = vld [vmem:[%s2890_s20 + $0x68] sm:$0xff]   ;;  %v2416_v28 = vld [vmem:[%s2890_s20 + $0x70] sm:$0xff]  }
  0x8f   : > { %2126 = vmatpush3.bf16.msra.mxu0 %v2396_v2  ;;  %2173 = vmatprep.subr.bf16.mxu1 %v2420_v12  ;;  %v2417_v29 = vld [vmem:[%s2890_s20 + $0x78] sm:$0xff]   ;;  %v2424_v30 = vld [vmem:[#allocation8 + $0x30] sm:$0xff]   ;;  %v2426_v32 = vld [vmem:[#allocation8 + $0x40] sm:$0xff]   ;;  %p2566_p4 = pnand %p2565_p2, %p2559_p7 }
  0x90   : > { %2127 = vmatprep.subr.bf16.mxu0 %v2397_v3  ;;  %v2425_v31 = vld [vmem:[#allocation8 + $0x38] sm:$0xff]   ;;  %v2427_v33 = vld [vmem:[#allocation8 + $0x48] sm:$0xff]   ;;  %v2428_v34 = vld [vmem:[#allocation8 + $0x50] sm:$0xff]  }
  0x91   : > { %v2429_v35 = vld [vmem:[#allocation8 + $0x58] sm:$0xff]   ;;  %v2430_v36 = vld [vmem:[#allocation8 + $0x60] sm:$0xff]   ;;  %v2431_v37 = vld [vmem:[#allocation8 + $0x68] sm:$0xff]  }
  0x92   : > { %2174 = vmatpush3.bf16.msra.mxu1 %v2420_v12  ;;  %v2432_v38 = vld [vmem:[#allocation8 + $0x70] sm:$0xff]   ;;  %v2923_v39 = vld [vmem:[%s3508_s2] ss:$0 sm:$0xff] }
  0x93   : > { %2128 = vmatpush3.bf16.msra.mxu0 %v2397_v3  ;;  %2175 = vmatprep.subr.bf16.mxu1 %v2421_v14 }
  0x94   : > { %2129 = vmatprep.subr.bf16.mxu0 %v2398_v5 }
  0x96   : > { %2176 = vmatpush3.bf16.msra.mxu1 %v2421_v14 }
  0x97   : > { %2130 = vmatpush3.bf16.msra.mxu0 %v2398_v5  ;;  %2177 = vmatprep.subr.bf16.mxu1 %v2422_v15 }
  0x98   : > { %2131 = vmatprep.subr.bf16.mxu0 %v2399_v6 }
  0x9a   : > { %2178 = vmatpush3.bf16.msra.mxu1 %v2422_v15 }
  0x9b   : > { %2132 = vmatpush3.bf16.msra.mxu0 %v2399_v6  ;;  %2179 = vmatprep.subr.bf16.mxu1 %v2423_v18 }
  0x9c   : > { %2133 = vmatprep.subr.bf16.mxu0 %v2400_v7 }
  0x9e   : > { %2180 = vmatpush3.bf16.msra.mxu1 %v2423_v18 }
  0x9f   : > { %2134 = vmatpush3.bf16.msra.mxu0 %v2400_v7  ;;  %2181 = vmatprep.subr.bf16.mxu1 %v2424_v30 }
  0xa0   : > { %2135 = vmatprep.subr.bf16.mxu0 %v2401_v8 }
  0xa2   : > { %2182 = vmatpush3.bf16.msra.mxu1 %v2424_v30 }
  0xa3   : > { %2136 = vmatpush3.bf16.msra.mxu0 %v2401_v8  ;;  %2183 = vmatprep.subr.bf16.mxu1 %v2425_v31 }
  0xa4   : > { %2217 = vmatprep.subr.bf16.mxu0 %v2426_v32 }
  0xa6   : > { %2138 = vmatmul.mubr.bf16.vlgmr.msra.gmra.mrb[0].mxu0 %v2403_v11  ;;  %2184 = vmatpush3.bf16.msra.mxu1 %v2425_v31 }
  0xa7   : > { %2141 = vmatprep.mubr.bf16.mxu0 %v2404_v13  ;;  %2218 = vmatpush3.bf16.msra.mxu0 %v2426_v32 }
  0xa8   : > { %2219 = vmatprep.subr.bf16.mxu0 %v2427_v33 }
  0xab   : > { %2220 = vmatpush3.bf16.msra.mxu0 %v2427_v33 }
  0xac   : > { %2221 = vmatprep.subr.bf16.mxu0 %v2428_v34 }
  0xae   : > { %2142 = vmatmul.mubr.bf16.gmra.mrb[4].mxu0 %v2405_v16 }
  0xaf   : > { %2145 = vmatprep.mubr.bf16.mxu0 %v2406_v17  ;;  %2222 = vmatpush3.bf16.msra.mxu0 %v2428_v34 }
  0xb0   : > { %2223 = vmatprep.subr.bf16.mxu0 %v2429_v35 }
  0xb3   : > { %2224 = vmatpush3.bf16.msra.mxu0 %v2429_v35 }
  0xb4   : > { %2225 = vmatprep.subr.bf16.mxu0 %v2430_v36 }
  0xb6   : > { %2146 = vmatmul.mubr.bf16.gmra.mrb[8].mxu0 %v2407_v19 }
  0xb7   : > { %2149 = vmatprep.mubr.bf16.mxu0 %v2408_v20  ;;  %2226 = vmatpush3.bf16.msra.mxu0 %v2430_v36 }
  0xb8   : > { %2227 = vmatprep.subr.bf16.mxu0 %v2431_v37 }
  0xbb   : > { %2228 = vmatpush3.bf16.msra.mxu0 %v2431_v37 }
  0xbc   : > { %2229 = vmatprep.subr.bf16.mxu0 %v2432_v38 }
  0xbe   : > { %2150 = vmatmul.mubr.bf16.gmra.mrb[12].mxu0 %v2409_v21 }
  0xbf   : > { %2153 = vmatprep.mubr.bf16.mxu0 %v2410_v22  ;;  %2230 = vmatpush3.bf16.msra.mxu0 %v2432_v38 }
  0xc6   : > { %2154 = vmatmul.mubr.bf16.gmra.mrb[16].mxu0 %v2411_v23 }
  0xc7   : > { %2157 = vmatprep.mubr.bf16.mxu0 %v2412_v24 }
  0xce   : > { %2158 = vmatmul.mubr.bf16.gmra.mrb[20].mxu0 %v2413_v25 }
  0xcf   : > { %2161 = vmatprep.mubr.bf16.mxu0 %v2414_v26 }
  0xd6   : > { %2162 = vmatmul.mubr.bf16.gmra.mrb[24].mxu0 %v2415_v27 }
  0xd7   : > { %2165 = vmatprep.mubr.bf16.mxu0 %v2416_v28 }
  0xde   : > { %2166 = vmatmul.mubr.bf16.gmra.mrb[28].mxu0 %v2417_v29 }
 0x179   : > { %v2139_v40 = vpop.f32.mrb[0].mxu0 }
 0x17a   : > { %v577_v41 = vpop.f32.mrb[1].mxu0  ;;  %v2929_v44 = vadd.f32 %v2139_v40, %v2923_v39 }
 0x17b   : > { %v2926_v42 = vadd.f32 %v2923_v39, %v577_v41  ;;  %v2140_v43 = vpop.f32.mrb[2].mxu0 }
 0x17c   : > { %v2932_v45 = vadd.f32 %v2140_v43, %v2923_v39  ;;  %v580_v46 = vpop.f32.mrb[3].mxu0  ;;  %v706_v51 = vmax.f32 %v2929_v44, 0.0 }
 0x17d   : > { %v2935_v47 = vadd.f32 %v2923_v39, %v580_v46  ;;  %v704_v49 = vmax.f32 %v2926_v42, 0.0 }
 0x17e   : > { %v707_v48 = vmax.f32 %v2932_v45, 0.0 }
 0x17f   : > { %v705_v50 = vmax.f32 %v2935_v47, 0.0 }
 0x180   : > { %v801_v54 = vpack.c.bf16 %v707_v48, %v706_v51 }
 0x181   : > { %v2143_v52 = vpop.f32.mrb[4].mxu0  ;;  %v800_v53 = vpack.c.bf16 %v705_v50, %v704_v49 }
 0x182   : > { %v593_v55 = vpop.f32.mrb[5].mxu0  ;;  %v2953_v58 = vadd.f32 %v2143_v52, %v2923_v39 }
 0x183   : > { %v2950_v56 = vadd.f32 %v2923_v39, %v593_v55  ;;  %v2144_v57 = vpop.f32.mrb[6].mxu0  ;;  %2185 = vmatprep.mubr.bf16.mxu1 %v800_v53 }
 0x184   : > { %v2956_v59 = vadd.f32 %v2144_v57, %v2923_v39  ;;  %v596_v60 = vpop.f32.mrb[7].mxu0  ;;  %2186 = vmatmul.mubr.bf16.vlgmr.msra.gmra.mrb[0].mxu1 %v801_v54  ;;  %v710_v1 = vmax.f32 %v2953_v58, 0.0 }
 0x185   : > { %v2959_v61 = vadd.f32 %v2923_v39, %v596_v60  ;;  %v708_v63 = vmax.f32 %v2950_v56, 0.0 }
 0x186   : > { %v711_v62 = vmax.f32 %v2956_v59, 0.0 }
 0x187   : > { %v709_v0 = vmax.f32 %v2959_v61, 0.0 }
 0x188   : > { %v803_v4 = vpack.c.bf16 %v711_v62, %v710_v1 }
 0x189   : > { %v802_v2 = vpack.c.bf16 %v709_v0, %v708_v63  ;;  %v2147_v3 = vpop.f32.mrb[8].mxu0 }
 0x18a   : > { %v609_v5 = vpop.f32.mrb[9].mxu0  ;;  %v2977_v8 = vadd.f32 %v2147_v3, %v2923_v39 }
 0x18b   : > { %v2974_v6 = vadd.f32 %v2923_v39, %v609_v5  ;;  %v2148_v7 = vpop.f32.mrb[10].mxu0  ;;  %2189 = vmatprep.mubr.bf16.mxu1 %v802_v2 }
 0x18c   : > { %v2980_v9 = vadd.f32 %v2148_v7, %v2923_v39  ;;  %v612_v10 = vpop.f32.mrb[11].mxu0  ;;  %2190 = vmatmul.mubr.bf16.gmra.mrb[4].mxu1 %v803_v4  ;;  %v714_v15 = vmax.f32 %v2977_v8, 0.0 }
 0x18d   : > { %v2983_v11 = vadd.f32 %v2923_v39, %v612_v10  ;;  %v712_v13 = vmax.f32 %v2974_v6, 0.0 }
 0x18e   : > { %v715_v12 = vmax.f32 %v2980_v9, 0.0 }
 0x18f   : > { %v713_v14 = vmax.f32 %v2983_v11, 0.0 }
 0x190   : > { %v805_v18 = vpack.c.bf16 %v715_v12, %v714_v15 }
 0x191   : > { %v804_v16 = vpack.c.bf16 %v713_v14, %v712_v13  ;;  %v2151_v17 = vpop.f32.mrb[12].mxu0 }
 0x192   : > { %v625_v19 = vpop.f32.mrb[13].mxu0  ;;  %v3001_v22 = vadd.f32 %v2151_v17, %v2923_v39 }
 0x193   : > { %v2998_v20 = vadd.f32 %v2923_v39, %v625_v19  ;;  %v2152_v21 = vpop.f32.mrb[14].mxu0  ;;  %2193 = vmatprep.mubr.bf16.mxu1 %v804_v16 }
 0x194   : > { %v3004_v23 = vadd.f32 %v2152_v21, %v2923_v39  ;;  %v628_v24 = vpop.f32.mrb[15].mxu0  ;;  %2194 = vmatmul.mubr.bf16.gmra.mrb[8].mxu1 %v805_v18  ;;  %v718_v29 = vmax.f32 %v3001_v22, 0.0 }
 0x195   : > { %v3007_v25 = vadd.f32 %v2923_v39, %v628_v24  ;;  %v716_v27 = vmax.f32 %v2998_v20, 0.0 }
 0x196   : > { %v719_v26 = vmax.f32 %v3004_v23, 0.0 }
 0x197   : > { %v717_v28 = vmax.f32 %v3007_v25, 0.0 }
 0x198   : > { %v807_v32 = vpack.c.bf16 %v719_v26, %v718_v29 }
 0x199   : > { %v806_v30 = vpack.c.bf16 %v717_v28, %v716_v27  ;;  %v2155_v31 = vpop.f32.mrb[16].mxu0 }
 0x19a   : > { %v641_v33 = vpop.f32.mrb[17].mxu0  ;;  %v3025_v36 = vadd.f32 %v2155_v31, %v2923_v39 }
 0x19b   : > { %v3022_v34 = vadd.f32 %v2923_v39, %v641_v33  ;;  %v2156_v35 = vpop.f32.mrb[18].mxu0  ;;  %2197 = vmatprep.mubr.bf16.mxu1 %v806_v30 }
 0x19c   : > { %v3028_v37 = vadd.f32 %v2156_v35, %v2923_v39  ;;  %v644_v38 = vpop.f32.mrb[19].mxu0  ;;  %2198 = vmatmul.mubr.bf16.gmra.mrb[12].mxu1 %v807_v32  ;;  %v3530_v52 = vmax.f32 %v3025_v36, 0.0 }
 0x19d   : > { %v3031_v40 = vadd.f32 %v2923_v39, %v644_v38  ;;  %v720_v43 = vmax.f32 %v3022_v34, 0.0 }
 0x19e   : > { %v723_v41 = vmax.f32 %v3028_v37, 0.0 }
 0x19f   : > { %v3531_v46 = vmax.f32 %v3031_v40, 0.0 }
 0x1a0   : > { %v809_v55 = vpack.c.bf16 %v723_v41, %v3530_v52 }
 0x1a1   : > { %v808_v53 = vpack.c.bf16 %v3531_v46, %v720_v43  ;;  %v2159_v54 = vpop.f32.mrb[20].mxu0 }
 0x1a2   : > { %v657_v57 = vpop.f32.mrb[21].mxu0  ;;  %v3049_v3 = vadd.f32 %v2159_v54, %v2923_v39 }
 0x1a3   : > { %v3046_v60 = vadd.f32 %v2923_v39, %v657_v57  ;;  %v2160_v2 = vpop.f32.mrb[22].mxu0  ;;  %2201 = vmatprep.mubr.bf16.mxu1 %v808_v53 }
 0x1a4   : > { %v3052_v4 = vadd.f32 %v2160_v2, %v2923_v39  ;;  %v660_v5 = vpop.f32.mrb[23].mxu0  ;;  %2202 = vmatmul.mubr.bf16.gmra.mrb[16].mxu1 %v809_v55  ;;  %v3518_v18 = vmax.f32 %v3049_v3, 0.0 }
 0x1a5   : > { %v3055_v7 = vadd.f32 %v2923_v39, %v660_v5  ;;  %v3524_v16 = vmax.f32 %v3046_v60, 0.0 }
 0x1a6   : > { %v3529_v10 = vmax.f32 %v3052_v4, 0.0 }
 0x1a7   : > { %v3519_v17 = vmax.f32 %v3055_v7, 0.0 }
 0x1a8   : > { %v811_v24 = vpack.c.bf16 %v3529_v10, %v3518_v18 }
 0x1a9   : > { %v810_v19 = vpack.c.bf16 %v3519_v17, %v3524_v16  ;;  %v2163_v21 = vpop.f32.mrb[24].mxu0  ;;  %v2437_v16 = vld [vmem:[#allocation9 + $0x18] sm:$0xff]  }
 0x1aa   : > { %v673_v30 = vpop.f32.mrb[25].mxu0  ;;  %v3073_v33 = vadd.f32 %v2163_v21, %v2923_v39 }
 0x1ab   : > { %v3070_v31 = vadd.f32 %v2923_v39, %v673_v30  ;;  %v2164_v32 = vpop.f32.mrb[26].mxu0  ;;  %2205 = vmatprep.mubr.bf16.mxu1 %v810_v19 }
 0x1ac   : > { %v3076_v35 = vadd.f32 %v2164_v32, %v2923_v39  ;;  %v676_v38 = vpop.f32.mrb[27].mxu0  ;;  %2206 = vmatmul.mubr.bf16.gmra.mrb[20].mxu1 %v811_v24  ;;  %v3522_v2 = vmax.f32 %v3073_v33, 0.0 }
 0x1ad   : > { %v3079_v53 = vadd.f32 %v2923_v39, %v676_v38  ;;  %v3521_v55 = vmax.f32 %v3070_v31, 0.0 }
 0x1ae   : > { %v3523_v54 = vmax.f32 %v3076_v35, 0.0 }
 0x1af   : > { %v3520_v57 = vmax.f32 %v3079_v53, 0.0 }
 0x1b0   : > { %v813_v21 = vpack.c.bf16 %v3523_v54, %v3522_v2 }
 0x1b1   : > { %v812_v5 = vpack.c.bf16 %v3520_v57, %v3521_v55  ;;  %v2167_v19 = vpop.f32.mrb[28].mxu0 }
 0x1b2   : > { %v689_v24 = vpop.f32.mrb[29].mxu0  ;;  %v3097_v38 = vadd.f32 %v2167_v19, %v2923_v39 }
 0x1b3   : > { %v3094_v30 = vadd.f32 %v2923_v39, %v689_v24  ;;  %v2168_v32 = vpop.f32.mrb[30].mxu0  ;;  %2209 = vmatprep.mubr.bf16.mxu1 %v812_v5 }
 0x1b4   : > { %v3100_v18 = vadd.f32 %v2168_v32, %v2923_v39  ;;  %v692_v17 = vpop.f32.mrb[31].mxu0  ;;  %2210 = vmatmul.mubr.bf16.gmra.mrb[24].mxu1 %v813_v21  ;;  %v3526_v54 = vmax.f32 %v3097_v38, 0.0  ;;  %v2435_v21 = vld [vmem:[#allocation9 + $0x8] sm:$0xff]   ;;  %v2436_v32 = vld [vmem:[#allocation9 + $0x10] sm:$0xff]  }
 0x1b5   : > { %v3103_v57 = vadd.f32 %v2923_v39, %v692_v17  ;;  %v3527_v2 = vmax.f32 %v3094_v30, 0.0  ;;  %v2433_v39 = vld [vmem:[#allocation8 + $0x78] sm:$0xff]   ;;  %v2434_v17 = vld [vmem:[#allocation9] sm:$0xff]  }
 0x1b6   : > { %v3528_v55 = vmax.f32 %v3100_v18, 0.0  ;;  %2231 = vmatprep.subr.bf16.mxu0 %v2433_v39  ;;  %2265 = vmatprep.subr.bf16.mxu1 %v2434_v17 }
 0x1b7   : > { %v3525_v24 = vmax.f32 %v3103_v57, 0.0  ;;  %2232 = vmatpush3.bf16.msra.mxu0 %v2433_v39  ;;  %2266 = vmatpush3.bf16.msra.mxu1 %v2434_v17 }
 0x1b8   : > { %v815_v19 = vpack.c.bf16 %v3528_v55, %v3526_v54  ;;  %2267 = vmatprep.subr.bf16.mxu1 %v2435_v21  ;;  %v2439_v54 = vld [vmem:[#allocation9 + $0x28] sm:$0xff]  }
 0x1b9   : > { %v814_v5 = vpack.c.bf16 %v3525_v24, %v3527_v2  ;;  %v2438_v24 = vld [vmem:[#allocation9 + $0x20] sm:$0xff]  }
 0x1bb   : > { %2213 = vmatprep.mubr.bf16.mxu1 %v814_v5  ;;  %2268 = vmatpush3.bf16.msra.mxu1 %v2435_v21  ;;  %v2440_v5 = vld [vmem:[#allocation9 + $0x30] sm:$0xff]  }
 0x1bc   : > { %2214 = vmatmul.mubr.bf16.gmra.mrb[28].mxu1 %v815_v19  ;;  %2269 = vmatprep.subr.bf16.mxu1 %v2436_v32  ;;  %v3120_v19 = vld [vmem:[%s3510_s4] ss:$0 sm:$0xff] }
 0x1bf   : > { %2270 = vmatpush3.bf16.msra.mxu1 %v2436_v32 }
 0x1c0   : > { %2271 = vmatprep.subr.bf16.mxu1 %v2437_v16 }
 0x1c3   : > { %2272 = vmatpush3.bf16.msra.mxu1 %v2437_v16 }
 0x1c4   : > { %2273 = vmatprep.subr.bf16.mxu1 %v2438_v24 }
 0x1c7   : > { %2274 = vmatpush3.bf16.msra.mxu1 %v2438_v24 }
 0x1c8   : > { %2275 = vmatprep.subr.bf16.mxu1 %v2439_v54 }
 0x1cb   : > { %2276 = vmatpush3.bf16.msra.mxu1 %v2439_v54 }
 0x1cc   : > { %2277 = vmatprep.subr.bf16.mxu1 %v2440_v5 }
 0x1cf   : > { %2278 = vmatpush3.bf16.msra.mxu1 %v2440_v5 }
 0x257   : > { %v2187_v39 = vpop.f32.mrb[0].mxu1 }
 0x258   : > { %v930_v17 = vadd.f32 %v2187_v39, %v3120_v19  ;;  %v921_v21 = vpop.f32.mrb[1].mxu1 }
 0x259   : > { %v922_v32 = vadd.f32 %v3120_v19, %v921_v21  ;;  %v2188_v16 = vpop.f32.mrb[2].mxu1 }
 0x25a   : > { %v933_v2 = vadd.f32 %v2188_v16, %v3120_v19  ;;  %v924_v24 = vpop.f32.mrb[3].mxu1  ;;  %v1050_v10 = vmax.f32 %v930_v17, 0.0 }
 0x25b   : > { %v1048_v55 = vmax.f32 %v922_v32, 0.0  ;;  %v925_v54 = vadd.f32 %v3120_v19, %v924_v24 }
 0x25c   : > { %v1051_v5 = vmax.f32 %v933_v2, 0.0  ;;  %v3140_v32 = vadd.f32 %v1050_v10, %v706_v51 }
 0x25d   : > { %v1049_v52 = vmax.f32 %v925_v54, 0.0  ;;  %v3132_v39 = vadd.f32 %v1048_v55, %v704_v49 }
 0x25e   : > { %v3128_v46 = vadd.f32 %v1051_v5, %v707_v48 }
 0x25f   : > { %v3136_v21 = vadd.f32 %v1049_v52, %v705_v50  ;;  %v2191_v16 = vpop.f32.mrb[4].mxu1 }
 0x260   : > { %v946_v2 = vadd.f32 %v2191_v16, %v3120_v19  ;;  %v937_v17 = vpop.f32.mrb[5].mxu1  ;;  %v1177_v49 = vpack.c.bf16 %v3128_v46, %v3140_v32 }
 0x261   : > { %v938_v45 = vadd.f32 %v3120_v19, %v937_v17  ;;  %v2192_v48 = vpop.f32.mrb[6].mxu1  ;;  %v1176_v42 = vpack.c.bf16 %v3136_v21, %v3132_v39 }
 0x262   : > { %v949_v47 = vadd.f32 %v2192_v48, %v3120_v19  ;;  %v940_v50 = vpop.f32.mrb[7].mxu1  ;;  %v1054_v51 = vmax.f32 %v946_v2, 0.0 }
 0x263   : > { %v1052_v52 = vmax.f32 %v938_v45, 0.0  ;;  %v941_v44 = vadd.f32 %v3120_v19, %v940_v50  ;;  %2233 = vmatprep.mubr.bf16.mxu0 %v1176_v42 }
 0x264   : > { %v1055_v10 = vmax.f32 %v949_v47, 0.0  ;;  %2234 = vmatmul.mubr.bf16.vlgmr.msra.gmra.mrb[32].mxu0 %v1177_v49  ;;  %v3164_v17 = vadd.f32 %v1054_v51, %v710_v1 }
 0x265   : > { %v1053_v55 = vmax.f32 %v941_v44, 0.0  ;;  %v3156_v54 = vadd.f32 %v1052_v52, %v708_v63 }
 0x266   : > { %v3152_v24 = vadd.f32 %v1055_v10, %v711_v62 }
 0x267   : > { %v3160_v5 = vadd.f32 %v1053_v55, %v709_v0  ;;  %v2195_v16 = vpop.f32.mrb[8].mxu1 }
 0x268   : > { %v962_v2 = vadd.f32 %v2195_v16, %v3120_v19  ;;  %v953_v45 = vpop.f32.mrb[9].mxu1  ;;  %v1179_v61 = vpack.c.bf16 %v3152_v24, %v3164_v17 }
 0x269   : > { %v954_v59 = vadd.f32 %v3120_v19, %v953_v45  ;;  %v2196_v62 = vpop.f32.mrb[10].mxu1  ;;  %v1178_v56 = vpack.c.bf16 %v3160_v5, %v3156_v54 }
 0x26a   : > { %v965_v63 = vadd.f32 %v2196_v62, %v3120_v19  ;;  %v956_v48 = vpop.f32.mrb[11].mxu1  ;;  %v1058_v1 = vmax.f32 %v962_v2, 0.0 }
 0x26b   : > { %v1056_v0 = vmax.f32 %v954_v59, 0.0  ;;  %v957_v58 = vadd.f32 %v3120_v19, %v956_v48  ;;  %2237 = vmatprep.mubr.bf16.mxu0 %v1178_v56 }
 0x26c   : > { %v1059_v42 = vmax.f32 %v965_v63, 0.0  ;;  %2238 = vmatmul.mubr.bf16.gmra.mrb[36].mxu0 %v1179_v61  ;;  %v3188_v51 = vadd.f32 %v1058_v1, %v714_v15 }
 0x26d   : > { %v1057_v49 = vmax.f32 %v957_v58, 0.0  ;;  %v3180_v50 = vadd.f32 %v1056_v0, %v712_v13 }
 0x26e   : > { %v3176_v47 = vadd.f32 %v1059_v42, %v715_v12 }
 0x26f   : > { %v3184_v52 = vadd.f32 %v1057_v49, %v713_v14  ;;  %v2199_v44 = vpop.f32.mrb[12].mxu1 }
 0x270   : > { %v978_v10 = vadd.f32 %v2199_v44, %v3120_v19  ;;  %v969_v55 = vpop.f32.mrb[13].mxu1  ;;  %v1181_v11 = vpack.c.bf16 %v3176_v47, %v3188_v51 }
 0x271   : > { %v970_v9 = vadd.f32 %v3120_v19, %v969_v55  ;;  %v2200_v12 = vpop.f32.mrb[14].mxu1  ;;  %v1180_v6 = vpack.c.bf16 %v3184_v52, %v3180_v50 }
 0x272   : > { %v981_v13 = vadd.f32 %v2200_v12, %v3120_v19  ;;  %v972_v16 = vpop.f32.mrb[15].mxu1  ;;  %v1062_v15 = vmax.f32 %v978_v10, 0.0  ;;  %v3547_v10 = vmax.f32 %v3031_v40, 0.0  ;;  %v3548_v12 = vmax.f32 %v3025_v36, 0.0 }
 0x273   : > { %v1060_v14 = vmax.f32 %v970_v9, 0.0  ;;  %v973_v8 = vadd.f32 %v3120_v19, %v972_v16  ;;  %2241 = vmatprep.mubr.bf16.mxu0 %v1180_v6 }
 0x274   : > { %v1063_v2 = vmax.f32 %v981_v13, 0.0  ;;  %2242 = vmatmul.mubr.bf16.gmra.mrb[40].mxu0 %v1181_v11  ;;  %v3212_v48 = vadd.f32 %v1062_v15, %v718_v29 }
 0x275   : > { %v1061_v45 = vmax.f32 %v973_v8, 0.0  ;;  %v3204_v62 = vadd.f32 %v1060_v14, %v716_v27 }
 0x276   : > { %v3200_v59 = vadd.f32 %v1063_v2, %v719_v26 }
 0x277   : > { %v3208_v56 = vadd.f32 %v1061_v45, %v717_v28  ;;  %v2203_v63 = vpop.f32.mrb[16].mxu1  ;;  %v3549_v45 = vmax.f32 %v3052_v4, 0.0 }
 0x278   : > { %v994_v61 = vadd.f32 %v2203_v63, %v3120_v19  ;;  %v985_v0 = vpop.f32.mrb[17].mxu1  ;;  %v1183_v25 = vpack.c.bf16 %v3200_v59, %v3212_v48 }
 0x279   : > { %v986_v23 = vadd.f32 %v3120_v19, %v985_v0  ;;  %v2204_v26 = vpop.f32.mrb[18].mxu1  ;;  %v1182_v20 = vpack.c.bf16 %v3208_v56, %v3204_v62 }
 0x27a   : > { %v997_v27 = vadd.f32 %v2204_v26, %v3120_v19  ;;  %v988_v58 = vpop.f32.mrb[19].mxu1  ;;  %v1066_v29 = vmax.f32 %v994_v61, 0.0  ;;  %v3550_v61 = vmax.f32 %v3046_v60, 0.0 }
 0x27b   : > { %v1064_v28 = vmax.f32 %v986_v23, 0.0  ;;  %v989_v22 = vadd.f32 %v3120_v19, %v988_v58  ;;  %2245 = vmatprep.mubr.bf16.mxu0 %v1182_v20  ;;  %v3551_v23 = vmax.f32 %v3055_v7, 0.0 }
 0x27c   : > { %v1067_v1 = vmax.f32 %v997_v27, 0.0  ;;  %2246 = vmatmul.mubr.bf16.gmra.mrb[44].mxu0 %v1183_v25  ;;  %v3236_v6 = vadd.f32 %v1066_v29, %v3548_v12  ;;  %v3552_v27 = vmax.f32 %v3049_v3, 0.0 }
 0x27d   : > { %v1065_v42 = vmax.f32 %v989_v22, 0.0  ;;  %v3228_v44 = vadd.f32 %v1064_v28, %v720_v43 }
 0x27e   : > { %v3224_v49 = vadd.f32 %v1067_v1, %v723_v41 }
 0x27f   : > { %v3232_v55 = vadd.f32 %v1065_v42, %v3547_v10  ;;  %v2207_v9 = vpop.f32.mrb[20].mxu1 }
 0x280   : > { %v1010_v13 = vadd.f32 %v2207_v9, %v3120_v19  ;;  %v1001_v16 = vpop.f32.mrb[21].mxu1  ;;  %v1185_v40 = vpack.c.bf16 %v3224_v49, %v3236_v6 }
 0x281   : > { %v1002_v37 = vadd.f32 %v3120_v19, %v1001_v16  ;;  %v2208_v41 = vpop.f32.mrb[22].mxu1  ;;  %v1184_v34 = vpack.c.bf16 %v3232_v55, %v3228_v44 }
 0x282   : > { %v1013_v43 = vadd.f32 %v2208_v41, %v3120_v19  ;;  %v1004_v11 = vpop.f32.mrb[23].mxu1  ;;  %v1070_v8 = vmax.f32 %v1010_v13, 0.0  ;;  %v3553_v13 = vmax.f32 %v3076_v35, 0.0 }
 0x283   : > { %v1068_v14 = vmax.f32 %v1002_v37, 0.0  ;;  %v1005_v36 = vadd.f32 %v3120_v19, %v1004_v11  ;;  %2249 = vmatprep.mubr.bf16.mxu0 %v1184_v34  ;;  %v3554_v37 = vmax.f32 %v3070_v31, 0.0  ;;  %v3555_v34 = vmax.f32 %v3079_v53, 0.0 }
 0x284   : > { %v1071_v15 = vmax.f32 %v1013_v43, 0.0  ;;  %2250 = vmatmul.mubr.bf16.gmra.mrb[48].mxu0 %v1185_v40  ;;  %v3260_v58 = vadd.f32 %v1070_v8, %v3552_v27  ;;  %v3556_v40 = vmax.f32 %v3073_v33, 0.0 }
 0x285   : > { %v1069_v2 = vmax.f32 %v1005_v36, 0.0  ;;  %v3252_v0 = vadd.f32 %v1068_v14, %v3550_v61 }
 0x286   : > { %v3248_v63 = vadd.f32 %v1071_v15, %v3549_v45 }
 0x287   : > { %v3256_v26 = vadd.f32 %v1069_v2, %v3551_v23  ;;  %v2211_v20 = vpop.f32.mrb[24].mxu1 }
 0x288   : > { %v1026_v25 = vadd.f32 %v2211_v20, %v3120_v19  ;;  %v1017_v28 = vpop.f32.mrb[25].mxu1  ;;  %v1187_v7 = vpack.c.bf16 %v3248_v63, %v3260_v58 }
 0x289   : > { %v1018_v4 = vadd.f32 %v3120_v19, %v1017_v28  ;;  %v2212_v22 = vpop.f32.mrb[26].mxu1  ;;  %v1186_v60 = vpack.c.bf16 %v3256_v26, %v3252_v0 }
 0x28a   : > { %v1029_v29 = vadd.f32 %v2212_v22, %v3120_v19  ;;  %v1020_v1 = vpop.f32.mrb[27].mxu1  ;;  %v1074_v10 = vmax.f32 %v1026_v25, 0.0  ;;  %v3557_v25 = vmax.f32 %v3100_v18, 0.0 }
 0x28b   : > { %v1072_v42 = vmax.f32 %v1018_v4, 0.0  ;;  %v1021_v3 = vadd.f32 %v3120_v19, %v1020_v1  ;;  %2253 = vmatprep.mubr.bf16.mxu0 %v1186_v60  ;;  %v3558_v4 = vmax.f32 %v3094_v30, 0.0  ;;  %v3559_v60 = vmax.f32 %v3103_v57, 0.0  ;;  %v3317_v57 = vld [vmem:[%s3510_s4 + $0x1] ss:$0 sm:$0xff] }
 0x28c   : > { %v1075_v9 = vmax.f32 %v1029_v29, 0.0  ;;  %2254 = vmatmul.mubr.bf16.gmra.mrb[52].mxu0 %v1187_v7  ;;  %v3284_v14 = vadd.f32 %v1074_v10, %v3556_v40  ;;  %v3560_v1 = vmax.f32 %v3097_v38, 0.0 }
 0x28d   : > { %v1073_v12 = vmax.f32 %v1021_v3, 0.0  ;;  %v3276_v41 = vadd.f32 %v1072_v42, %v3554_v37  ;;  %v2441_v42 = vld [vmem:[#allocation9 + $0x38] sm:$0xff]  }
 0x28e   : > { %v3272_v16 = vadd.f32 %v1075_v9, %v3553_v13  ;;  %2279 = vmatprep.subr.bf16.mxu1 %v2441_v42 }
 0x28f   : > { %v3280_v43 = vadd.f32 %v1073_v12, %v3555_v34  ;;  %v2215_v11 = vpop.f32.mrb[28].mxu1  ;;  %2280 = vmatpush3.bf16.msra.mxu1 %v2441_v42 }
 0x290   : > { %v1042_v36 = vadd.f32 %v2215_v11, %v3120_v19  ;;  %v1033_v8 = vpop.f32.mrb[29].mxu1  ;;  %v1189_v53 = vpack.c.bf16 %v3272_v16, %v3284_v14 }
 0x291   : > { %v1034_v35 = vadd.f32 %v3120_v19, %v1033_v8  ;;  %v2216_v15 = vpop.f32.mrb[30].mxu1  ;;  %v1188_v31 = vpack.c.bf16 %v3280_v43, %v3276_v41 }
 0x292   : > { %v1045_v2 = vadd.f32 %v2216_v15, %v3120_v19  ;;  %v1036_v45 = vpop.f32.mrb[31].mxu1  ;;  %v1078_v23 = vmax.f32 %v1042_v36, 0.0 }
 0x293   : > { %v1076_v61 = vmax.f32 %v1034_v35, 0.0  ;;  %v1037_v33 = vadd.f32 %v3120_v19, %v1036_v45  ;;  %2257 = vmatprep.mubr.bf16.mxu0 %v1188_v31 }
 0x294   : > { %v1079_v20 = vmax.f32 %v1045_v2, 0.0  ;;  %2258 = vmatmul.mubr.bf16.gmra.mrb[56].mxu0 %v1189_v53  ;;  %v3308_v19 = vadd.f32 %v1078_v23, %v3560_v1 }
 0x295   : > { %v1077_v27 = vmax.f32 %v1037_v33, 0.0  ;;  %v3300_v22 = vadd.f32 %v1076_v61, %v3558_v4 }
 0x296   : > { %v3296_v28 = vadd.f32 %v1079_v20, %v3557_v25 }
 0x297   : > { %v3304_v29 = vadd.f32 %v1077_v27, %v3559_v60 }
 0x298   : > { %v1191_v18 = vpack.c.bf16 %v3296_v28, %v3308_v19 }
 0x299   : > { %v1190_v7 = vpack.c.bf16 %v3304_v29, %v3300_v22 }
 0x29b   : > { %2261 = vmatprep.mubr.bf16.mxu0 %v1190_v7 }
 0x29c   : > { %2262 = vmatmul.mubr.bf16.gmra.mrb[60].mxu0 %v1191_v18 }
 0x337   : > { %v2235_v30 = vpop.f32.mrb[32].mxu0 }
 0x338   : > { %v1308_v38 = vadd.f32 %v2235_v30, %v3317_v57  ;;  %v1299_v3 = vpop.f32.mrb[33].mxu0 }
 0x339   : > { %v1300_v10 = vadd.f32 %v3317_v57, %v1299_v3  ;;  %v2236_v9 = vpop.f32.mrb[34].mxu0 }
 0x33a   : > { %v1428_v12 = vmax.f32 %v1308_v38, 0.0  ;;  %v1311_v13 = vadd.f32 %v2236_v9, %v3317_v57  ;;  %v1302_v37 = vpop.f32.mrb[35].mxu0 }
 0x33b   : > { %v1426_v34 = vmax.f32 %v1300_v10, 0.0  ;;  %v1303_v11 = vadd.f32 %v3317_v57, %v1302_v37 }
 0x33c   : > { %v1429_v40 = vmax.f32 %v1311_v13, 0.0  ;;  %v1460_v8 = vadd.f32 %v1428_v12, %v3140_v32 }
 0x33d   : > { %v1427_v36 = vmax.f32 %v1303_v11, 0.0  ;;  %v1458_v15 = vadd.f32 %v1426_v34, %v3132_v39 }
 0x33e   : > { %v1461_v35 = vadd.f32 %v1429_v40, %v3128_v46 }
 0x33f   : > { %v1459_v31 = vadd.f32 %v1427_v36, %v3136_v21  ;;  %v2239_v2 = vpop.f32.mrb[36].mxu0 }
 0x340   : > { %v1555_v45 = vpack.c.bf16 %v1461_v35, %v1460_v8  ;;  %v1324_v53 = vadd.f32 %v2239_v2, %v3317_v57  ;;  %v1315_v61 = vpop.f32.mrb[37].mxu0 }
 0x341   : > { %v1316_v33 = vadd.f32 %v3317_v57, %v1315_v61  ;;  %v2240_v23 = vpop.f32.mrb[38].mxu0  ;;  %v1554_v20 = vpack.c.bf16 %v1459_v31, %v1458_v15 }
 0x342   : > { %v1432_v27 = vmax.f32 %v1324_v53, 0.0  ;;  %v1327_v25 = vadd.f32 %v2240_v23, %v3317_v57  ;;  %v1318_v4 = vpop.f32.mrb[39].mxu0 }
 0x343   : > { %v1430_v32 = vmax.f32 %v1316_v33, 0.0  ;;  %v1319_v46 = vadd.f32 %v3317_v57, %v1318_v4  ;;  %2281 = vmatprep.mubr.bf16.mxu1 %v1554_v20 }
 0x344   : > { %v1433_v39 = vmax.f32 %v1327_v25, 0.0  ;;  %2282 = vmatmul.mubr.bf16.vlgmr.msra.gmra.mrb[32].mxu1 %v1555_v45  ;;  %v1464_v60 = vadd.f32 %v1432_v27, %v3164_v17 }
 0x345   : > { %v1431_v21 = vmax.f32 %v1319_v46, 0.0  ;;  %v1462_v7 = vadd.f32 %v1430_v32, %v3156_v54 }
 0x346   : > { %v1465_v1 = vadd.f32 %v1433_v39, %v3152_v24 }
 0x347   : > { %v1463_v18 = vadd.f32 %v1431_v21, %v3160_v5  ;;  %v2243_v42 = vpop.f32.mrb[40].mxu0 }
 0x348   : > { %v1340_v30 = vadd.f32 %v2243_v42, %v3317_v57  ;;  %v1331_v38 = vpop.f32.mrb[41].mxu0  ;;  %v1557_v3 = vpack.c.bf16 %v1465_v1, %v1464_v60 }
 0x349   : > { %v1332_v10 = vadd.f32 %v3317_v57, %v1331_v38  ;;  %v2244_v9 = vpop.f32.mrb[42].mxu0  ;;  %v1556_v12 = vpack.c.bf16 %v1463_v18, %v1462_v7 }
 0x34a   : > { %v1436_v13 = vmax.f32 %v1340_v30, 0.0  ;;  %v1343_v37 = vadd.f32 %v2244_v9, %v3317_v57  ;;  %v1334_v34 = vpop.f32.mrb[43].mxu0 }
 0x34b   : > { %v1434_v17 = vmax.f32 %v1332_v10, 0.0  ;;  %v1335_v24 = vadd.f32 %v3317_v57, %v1334_v34  ;;  %2285 = vmatprep.mubr.bf16.mxu1 %v1556_v12 }
 0x34c   : > { %v1437_v54 = vmax.f32 %v1343_v37, 0.0  ;;  %2286 = vmatmul.mubr.bf16.gmra.mrb[36].mxu1 %v1557_v3  ;;  %v1468_v11 = vadd.f32 %v1436_v13, %v3188_v51 }
 0x34d   : > { %v1435_v5 = vmax.f32 %v1335_v24, 0.0  ;;  %v1466_v36 = vadd.f32 %v1434_v17, %v3180_v50 }
 0x34e   : > { %v1469_v40 = vadd.f32 %v1437_v54, %v3176_v47 }
 0x34f   : > { %v1467_v8 = vadd.f32 %v1435_v5, %v3184_v52  ;;  %v2247_v35 = vpop.f32.mrb[44].mxu0 }
 0x350   : > { %v1356_v15 = vadd.f32 %v2247_v35, %v3317_v57  ;;  %v1347_v31 = vpop.f32.mrb[45].mxu0  ;;  %v1559_v2 = vpack.c.bf16 %v1469_v40, %v1468_v11 }
 0x351   : > { %v1348_v45 = vadd.f32 %v3317_v57, %v1347_v31  ;;  %v2248_v53 = vpop.f32.mrb[46].mxu0  ;;  %v1558_v61 = vpack.c.bf16 %v1467_v8, %v1466_v36 }
 0x352   : > { %v1440_v33 = vmax.f32 %v1356_v15, 0.0  ;;  %v1359_v23 = vadd.f32 %v2248_v53, %v3317_v57  ;;  %v1350_v20 = vpop.f32.mrb[47].mxu0 }
 0x353   : > { %v1438_v51 = vmax.f32 %v1348_v45, 0.0  ;;  %v1351_v47 = vadd.f32 %v3317_v57, %v1350_v20  ;;  %2289 = vmatprep.mubr.bf16.mxu1 %v1558_v61 }
 0x354   : > { %v1441_v50 = vmax.f32 %v1359_v23, 0.0  ;;  %2290 = vmatmul.mubr.bf16.gmra.mrb[40].mxu1 %v1559_v2  ;;  %v1472_v27 = vadd.f32 %v1440_v33, %v3212_v48 }
 0x355   : > { %v1439_v52 = vmax.f32 %v1351_v47, 0.0  ;;  %v1470_v4 = vadd.f32 %v1438_v51, %v3204_v62 }
 0x356   : > { %v1473_v25 = vadd.f32 %v1441_v50, %v3200_v59 }
 0x357   : > { %v1471_v32 = vadd.f32 %v1439_v52, %v3208_v56  ;;  %v2251_v46 = vpop.f32.mrb[48].mxu0 }
 0x358   : > { %v1372_v39 = vadd.f32 %v2251_v46, %v3317_v57  ;;  %v1363_v21 = vpop.f32.mrb[49].mxu0  ;;  %v1561_v60 = vpack.c.bf16 %v1473_v25, %v1472_v27 }
 0x359   : > { %v1364_v1 = vadd.f32 %v3317_v57, %v1363_v21  ;;  %v2252_v7 = vpop.f32.mrb[50].mxu0  ;;  %v1560_v18 = vpack.c.bf16 %v1471_v32, %v1470_v4 }
 0x35a   : > { %v1444_v42 = vmax.f32 %v1372_v39, 0.0  ;;  %v1375_v30 = vadd.f32 %v2252_v7, %v3317_v57  ;;  %v1366_v38 = vpop.f32.mrb[51].mxu0 }
 0x35b   : > { %v1442_v48 = vmax.f32 %v1364_v1, 0.0  ;;  %v1367_v59 = vadd.f32 %v3317_v57, %v1366_v38  ;;  %2293 = vmatprep.mubr.bf16.mxu1 %v1560_v18 }
 0x35c   : > { %v1445_v62 = vmax.f32 %v1375_v30, 0.0  ;;  %2294 = vmatmul.mubr.bf16.gmra.mrb[44].mxu1 %v1561_v60  ;;  %v1476_v3 = vadd.f32 %v1444_v42, %v3236_v6 }
 0x35d   : > { %v1443_v56 = vmax.f32 %v1367_v59, 0.0  ;;  %v1474_v9 = vadd.f32 %v1442_v48, %v3228_v44 }
 0x35e   : > { %v1477_v10 = vadd.f32 %v1445_v62, %v3224_v49 }
 0x35f   : > { %v1475_v12 = vadd.f32 %v1443_v56, %v3232_v55  ;;  %v2255_v13 = vpop.f32.mrb[52].mxu0 }
 0x360   : > { %v1388_v37 = vadd.f32 %v2255_v13, %v3317_v57  ;;  %v1379_v34 = vpop.f32.mrb[53].mxu0  ;;  %v1563_v17 = vpack.c.bf16 %v1477_v10, %v1476_v3 }
 0x361   : > { %v1380_v24 = vadd.f32 %v3317_v57, %v1379_v34  ;;  %v2256_v54 = vpop.f32.mrb[54].mxu0  ;;  %v1562_v5 = vpack.c.bf16 %v1475_v12, %v1474_v9 }
 0x362   : > { %v1448_v11 = vmax.f32 %v1388_v37, 0.0  ;;  %v1391_v40 = vadd.f32 %v2256_v54, %v3317_v57  ;;  %v1382_v36 = vpop.f32.mrb[55].mxu0 }
 0x363   : > { %v1446_v6 = vmax.f32 %v1380_v24, 0.0  ;;  %v1383_v49 = vadd.f32 %v3317_v57, %v1382_v36  ;;  %2297 = vmatprep.mubr.bf16.mxu1 %v1562_v5 }
 0x364   : > { %v1449_v44 = vmax.f32 %v1391_v40, 0.0  ;;  %2298 = vmatmul.mubr.bf16.gmra.mrb[48].mxu1 %v1563_v17  ;;  %v1480_v8 = vadd.f32 %v1448_v11, %v3260_v58 }
 0x365   : > { %v1447_v55 = vmax.f32 %v1383_v49, 0.0  ;;  %v1478_v15 = vadd.f32 %v1446_v6, %v3252_v0 }
 0x366   : > { %v1481_v35 = vadd.f32 %v1449_v44, %v3248_v63 }
 0x367   : > { %v1479_v31 = vadd.f32 %v1447_v55, %v3256_v26  ;;  %v2259_v2 = vpop.f32.mrb[56].mxu0 }
 0x368   : > { %v1404_v45 = vadd.f32 %v2259_v2, %v3317_v57  ;;  %v1395_v53 = vpop.f32.mrb[57].mxu0  ;;  %v1565_v61 = vpack.c.bf16 %v1481_v35, %v1480_v8 }
 0x369   : > { %v1396_v33 = vadd.f32 %v3317_v57, %v1395_v53  ;;  %v2260_v23 = vpop.f32.mrb[58].mxu0  ;;  %v1564_v20 = vpack.c.bf16 %v1479_v31, %v1478_v15 }
 0x36a   : > { %v1452_v51 = vmax.f32 %v1404_v45, 0.0  ;;  %v1407_v47 = vadd.f32 %v2260_v23, %v3317_v57  ;;  %v1398_v50 = vpop.f32.mrb[59].mxu0 }
 0x36b   : > { %v1450_v58 = vmax.f32 %v1396_v33, 0.0  ;;  %v1399_v63 = vadd.f32 %v3317_v57, %v1398_v50  ;;  %2301 = vmatprep.mubr.bf16.mxu1 %v1564_v20 }
 0x36c   : > { %v1453_v0 = vmax.f32 %v1407_v47, 0.0  ;;  %2302 = vmatmul.mubr.bf16.gmra.mrb[52].mxu1 %v1565_v61  ;;  %v1484_v52 = vadd.f32 %v1452_v51, %v3284_v14 }
 0x36d   : > { %v1451_v26 = vmax.f32 %v1399_v63, 0.0  ;;  %v1482_v25 = vadd.f32 %v1450_v58, %v3276_v41 }
 0x36e   : > { %v1485_v27 = vadd.f32 %v1453_v0, %v3272_v16 }
 0x36f   : > { %v1483_v4 = vadd.f32 %v1451_v26, %v3280_v43  ;;  %v2263_v32 = vpop.f32.mrb[60].mxu0 }
 0x370   : > { %v1420_v46 = vadd.f32 %v2263_v32, %v3317_v57  ;;  %v1411_v39 = vpop.f32.mrb[61].mxu0  ;;  %v1567_v21 = vpack.c.bf16 %v1485_v27, %v1484_v52 }
 0x371   : > { %v1412_v60 = vadd.f32 %v3317_v57, %v1411_v39  ;;  %v2264_v1 = vpop.f32.mrb[62].mxu0  ;;  %v1566_v7 = vpack.c.bf16 %v1483_v4, %v1482_v25 }
 0x372   : > { %v1456_v18 = vmax.f32 %v1420_v46, 0.0  ;;  %v1423_v42 = vadd.f32 %v2264_v1, %v3317_v57  ;;  %v1414_v14 = vpop.f32.mrb[63].mxu0 }
 0x373   : > { %v1454_v30 = vmax.f32 %v1412_v60, 0.0  ;;  %v1415_v16 = vadd.f32 %v3317_v57, %v1414_v14  ;;  %2305 = vmatprep.mubr.bf16.mxu1 %v1566_v7  ;;  %v3387_v57 = vld [vmem:[%s3512_s6] ss:$0 sm:$0xff] }
 0x374   : > { %v1457_v41 = vmax.f32 %v1423_v42, 0.0  ;;  %2306 = vmatmul.mubr.bf16.gmra.mrb[56].mxu1 %v1567_v21  ;;  %v1488_v38 = vadd.f32 %v1456_v18, %v3308_v19 }
 0x375   : > { %v1455_v43 = vmax.f32 %v1415_v16, 0.0  ;;  %v1486_v59 = vadd.f32 %v1454_v30, %v3300_v22 }
 0x376   : > { %v1489_v48 = vadd.f32 %v1457_v41, %v3296_v28 }
 0x377   : > { %v1487_v62 = vadd.f32 %v1455_v43, %v3304_v29 }
 0x378   : > { %v1569_v56 = vpack.c.bf16 %v1489_v48, %v1488_v38 }
 0x379   : > { %v1568_v3 = vpack.c.bf16 %v1487_v62, %v1486_v59 }
 0x37b   : > { %2309 = vmatprep.mubr.bf16.mxu1 %v1568_v3 }
 0x37c   : > { %2310 = vmatmul.mubr.bf16.gmra.mrb[60].mxu1 %v1569_v56 }
 0x417   : > { %v2283_v10 = vpop.f32.mrb[32].mxu1 }
 0x418   : > { %v1684_v9 = vadd.f32 %v2283_v10, %v3387_v57  ;;  %v1675_v19 = vpop.f32.mrb[33].mxu1 }
 0x419   : > { %v1676_v28 = vadd.f32 %v3387_v57, %v1675_v19  ;;  %v2284_v12 = vpop.f32.mrb[34].mxu1 }
 0x41a   : > { %1804 = vst [vmem:[%s3391_s16 + $0x10] sm:$0xff] %v1684_v9  ;;  %v1687_v22 = vadd.f32 %v2284_v12, %v3387_v57  ;;  %v1678_v29 = vpop.f32.mrb[35].mxu1 }
 0x41b   : > { %1802 = vst [vmem:[%s3391_s16] sm:$0xff] %v1676_v28  ;;  %v1679_v13 = vadd.f32 %v3387_v57, %v1678_v29 }
 0x41c   : > { %1805 = vst [vmem:[%s3391_s16 + $0x18] sm:$0xff] %v1687_v22 }
 0x41d   : > { %1803 = vst [vmem:[%s3391_s16 + $0x8] sm:$0xff] %v1679_v13 }
 0x41f   : > { %v2287_v37 = vpop.f32.mrb[36].mxu1 }
 0x420   : > { %v1700_v34 = vadd.f32 %v2287_v37, %v3387_v57  ;;  %v1691_v17 = vpop.f32.mrb[37].mxu1 }
 0x421   : > { %v1692_v24 = vadd.f32 %v3387_v57, %v1691_v17  ;;  %v2288_v54 = vpop.f32.mrb[38].mxu1 }
 0x422   : > { %1808 = vst [vmem:[%s3391_s16 + $0x30] sm:$0xff] %v1700_v34  ;;  %v1703_v5 = vadd.f32 %v2288_v54, %v3387_v57  ;;  %v1694_v11 = vpop.f32.mrb[39].mxu1 }
 0x423   : > { %1806 = vst [vmem:[%s3391_s16 + $0x20] sm:$0xff] %v1692_v24  ;;  %v1695_v40 = vadd.f32 %v3387_v57, %v1694_v11 }
 0x424   : > { %1809 = vst [vmem:[%s3391_s16 + $0x38] sm:$0xff] %v1703_v5 }
 0x425   : > { %1807 = vst [vmem:[%s3391_s16 + $0x28] sm:$0xff] %v1695_v40 }
 0x427   : > { %v2291_v36 = vpop.f32.mrb[40].mxu1 }
 0x428   : > { %v1716_v6 = vadd.f32 %v2291_v36, %v3387_v57  ;;  %v1707_v49 = vpop.f32.mrb[41].mxu1 }
 0x429   : > { %v1708_v44 = vadd.f32 %v3387_v57, %v1707_v49  ;;  %v2292_v55 = vpop.f32.mrb[42].mxu1 }
 0x42a   : > { %1812 = vst [vmem:[%s3391_s16 + $0x50] sm:$0xff] %v1716_v6  ;;  %v1719_v8 = vadd.f32 %v2292_v55, %v3387_v57  ;;  %v1710_v35 = vpop.f32.mrb[43].mxu1 }
 0x42b   : > { %1810 = vst [vmem:[%s3391_s16 + $0x40] sm:$0xff] %v1708_v44  ;;  %v1711_v15 = vadd.f32 %v3387_v57, %v1710_v35 }
 0x42c   : > { %1813 = vst [vmem:[%s3391_s16 + $0x58] sm:$0xff] %v1719_v8 }
 0x42d   : > { %1811 = vst [vmem:[%s3391_s16 + $0x48] sm:$0xff] %v1711_v15 }
 0x42f   : > { %v2295_v31 = vpop.f32.mrb[44].mxu1 }
 0x430   : > { %v1732_v2 = vadd.f32 %v2295_v31, %v3387_v57  ;;  %v1723_v45 = vpop.f32.mrb[45].mxu1 }
 0x431   : > { %v1724_v53 = vadd.f32 %v3387_v57, %v1723_v45  ;;  %v2296_v61 = vpop.f32.mrb[46].mxu1 }
 0x432   : > { %1816 = vst [vmem:[%s3391_s16 + $0x70] sm:$0xff] %v1732_v2  ;;  %v1735_v33 = vadd.f32 %v2296_v61, %v3387_v57  ;;  %v1726_v23 = vpop.f32.mrb[47].mxu1 }
 0x433   : > { %1814 = vst [vmem:[%s3391_s16 + $0x60] sm:$0xff] %v1724_v53  ;;  %v1727_v20 = vadd.f32 %v3387_v57, %v1726_v23 }
 0x434   : > { %1817 = vst [vmem:[%s3391_s16 + $0x78] sm:$0xff] %v1735_v33 }
 0x435   : > { %1815 = vst [vmem:[%s3391_s16 + $0x68] sm:$0xff] %v1727_v20 }
 0x437   : > { %v2299_v51 = vpop.f32.mrb[48].mxu1 }
 0x438   : > { %v1748_v47 = vadd.f32 %v2299_v51, %v3387_v57  ;;  %v1739_v50 = vpop.f32.mrb[49].mxu1 }
 0x439   : > { %v1740_v58 = vadd.f32 %v3387_v57, %v1739_v50  ;;  %v2300_v63 = vpop.f32.mrb[50].mxu1 }
 0x43a   : > { %1820 = vst [vmem:[%s3391_s16 + $0x90] sm:$0xff] %v1748_v47  ;;  %v1751_v0 = vadd.f32 %v2300_v63, %v3387_v57  ;;  %v1742_v26 = vpop.f32.mrb[51].mxu1 }
 0x43b   : > { %1818 = vst [vmem:[%s3391_s16 + $0x80] sm:$0xff] %v1740_v58  ;;  %v1743_v52 = vadd.f32 %v3387_v57, %v1742_v26 }
 0x43c   : > { %1821 = vst [vmem:[%s3391_s16 + $0x98] sm:$0xff] %v1751_v0 }
 0x43d   : > { %1819 = vst [vmem:[%s3391_s16 + $0x88] sm:$0xff] %v1743_v52 }
 0x43f   : > { %v2303_v27 = vpop.f32.mrb[52].mxu1 }
 0x440   : > { %v1764_v25 = vadd.f32 %v2303_v27, %v3387_v57  ;;  %v1755_v4 = vpop.f32.mrb[53].mxu1 }
 0x441   : > { %v1756_v32 = vadd.f32 %v3387_v57, %v1755_v4  ;;  %v2304_v46 = vpop.f32.mrb[54].mxu1 }
 0x442   : > { %1824 = vst [vmem:[%s3391_s16 + $0xb0] sm:$0xff] %v1764_v25  ;;  %v1767_v39 = vadd.f32 %v2304_v46, %v3387_v57  ;;  %v1758_v21 = vpop.f32.mrb[55].mxu1 }
 0x443   : > { %1822 = vst [vmem:[%s3391_s16 + $0xa0] sm:$0xff] %v1756_v32  ;;  %v1759_v60 = vadd.f32 %v3387_v57, %v1758_v21 }
 0x444   : > { %1825 = vst [vmem:[%s3391_s16 + $0xb8] sm:$0xff] %v1767_v39 }
 0x445   : > { %1823 = vst [vmem:[%s3391_s16 + $0xa8] sm:$0xff] %v1759_v60 }
 0x447   : > { %v2307_v1 = vpop.f32.mrb[56].mxu1 }
 0x448   : > { %v1780_v7 = vadd.f32 %v2307_v1, %v3387_v57  ;;  %v1771_v18 = vpop.f32.mrb[57].mxu1 }
 0x449   : > { %v1772_v42 = vadd.f32 %v3387_v57, %v1771_v18  ;;  %v2308_v14 = vpop.f32.mrb[58].mxu1 }
 0x44a   : > { %1828 = vst [vmem:[%s3391_s16 + $0xd0] sm:$0xff] %v1780_v7  ;;  %v1783_v30 = vadd.f32 %v2308_v14, %v3387_v57  ;;  %v1774_v16 = vpop.f32.mrb[59].mxu1 }
 0x44b   : > { %1826 = vst [vmem:[%s3391_s16 + $0xc0] sm:$0xff] %v1772_v42  ;;  %v1775_v41 = vadd.f32 %v3387_v57, %v1774_v16 }
 0x44c   : > { %1829 = vst [vmem:[%s3391_s16 + $0xd8] sm:$0xff] %v1783_v30 }
 0x44d   : > { %1827 = vst [vmem:[%s3391_s16 + $0xc8] sm:$0xff] %v1775_v41 }
 0x44f   : > { %v2311_v43 = vpop.f32.mrb[60].mxu1 }
 0x450   : > { %v1796_v38 = vadd.f32 %v2311_v43, %v3387_v57  ;;  %v1787_v48 = vpop.f32.mrb[61].mxu1 }
 0x451   : > { %v1788_v59 = vadd.f32 %v3387_v57, %v1787_v48  ;;  %v2312_v62 = vpop.f32.mrb[62].mxu1 }
 0x452   : > { %1832 = vst [vmem:[%s3391_s16 + $0xf0] sm:$0xff] %v1796_v38  ;;  %v1799_v56 = vadd.f32 %v2312_v62, %v3387_v57  ;;  %v1790_v3 = vpop.f32.mrb[63].mxu1 }
 0x453   : > { %1830 = vst [vmem:[%s3391_s16 + $0xe0] sm:$0xff] %v1788_v59  ;;  %v1791_v10 = vadd.f32 %v3387_v57, %v1790_v3 }
 0x454   : > { %1833 = vst [vmem:[%s3391_s16 + $0xf8] sm:$0xff] %v1799_v56 }
 0x455   : > { %1831 = vst [vmem:[%s3391_s16 + $0xe8] sm:$0xff] %v1791_v10 }
 0x456   : > { %2569 = shalt.err (!%p2566_p4)
}
 0x457   : > { %s2570_s14 = scalar_lea.hbm %s3456_s30, 4096  ;;  %s2574_s21 = scalar_lea.hbm %s3513_s7, 8192 }
 0x458   : > { %p2571_p9 = scmp.ne.s32.totalorder %s3456_s30, %s2570_s14  ;;  %p2575_p8 = scmp.lt.u32.totalorder %s3456_s30, %s3513_s7 }
 0x459   : > { %p2576_p13 = scmp.lt.u32.totalorder %s2574_s21, %s2570_s14  ;;  %p2578_p10 = scmp.lt.u32.totalorder %s2570_s14, %s3456_s30 }
 0x45a   : > { %p2572_p0 = pnand %p2571_p9, %p2835_p5 }
 0x45b   : > { %p2577_p6 = por %p2576_p13, %p2575_p8 }
 0x45c   : > { %p2573_p11 = pneg %p2572_p0 }
 0x45d   : > { %p2579_p3 = por %p2578_p10, %p2577_p6 }
 0x45f   : > { %p2580_p7 = pnand %p2579_p3, %p2573_p11 }
 0x461   : > { %2583 = shalt.err (!%p2580_p7)
}
 0x462   : > { %s2639_s11 = smov 128   ;;  %s2640_s20 = smov 8  }
 0x463   : > { %2327 = dma.vmem_to_hbm [thread:$0]  (%p2835_p5), %s3458_s23, 4096, %s3456_s30, %s1835_s28, %s2639_s11, %s2639_s11, %s2640_s20  }
 0x464 PF: > { %s3561_s9 = sld [smem:[#allocation16_spill]]  ;;  %s1863_s13 = sand.u32 1, %s2618_s24  }
 0x465   : > { %p3563_p1 = scmp.ge.s32.totalorder %s2630_s27, 2  ;;  %s1864_s15 = scalar_lea.sflag [#allocation5], %s1863_s13 }
 0x46a   : > { %p3562_p12 = scmp.ne.s32.totalorder %s3561_s9, 0 }
 0x46c   : > { %p2344_p2 = pnand %p3563_p1, %p3562_p12 }
 0x46e   : > { %2613 = dma.done.wait (!%p2344_p2), %s1864_s15, 4096  }
 0x46f   : > { %2615 = vsyncadd (!%p2344_p2), %s1864_s15, 4294963200  ;;  %p22_p4 = scmp.ge.s32.totalorder %s2821_s22, 4   ;;  %s3564_s24 = smov %s2622_s25 }
 0x470   : > { %s3565_s25 = smov %s2626_s26  ;;  %s3566_s26 = smov %s2831_s18 }
 0x471   : > { %s3567_s27 = smov %s2821_s22  ;;  %24 = sbr.rel (!%p22_p4) target bundleno = 7 (0x7), region = 107 }
 0x478   :  { %1869 = vsyncpa [#allocation4], 1 }
 0x479   :  { %1871 = vsyncpa [#allocation4 + $0x1], 1 }
 0x47a   :  { %1872 = vsyncpa [#allocation7], 1 }
 0x47b   :  { %1873 = vsyncpa [#allocation10], 1 }
 0x47c   :  { %1874 = vsyncpa [#allocation5], 1 }
 0x47d   :  { %1876 = vsyncpa [#allocation5 + $0x1], 1 }

</bundles_post_ra>
